<compile_context>
chip_gen: v7x
topology: tpu7x:2x2x1
jax: 0.10.0
libtpu: 0.0.40
codegen_flags: <defaults>
</compile_context>

<pallas_src>
import jax
import jax.numpy as jnp
from jax.experimental import pallas as pl
from jax.experimental.pallas import tpu as pltpu


_IN = 28 * 28
_HID = 64
_OUT = 10
_OUT_PAD = 128          # lane-dense output width (multiple of 128)
_NEG = -1e30            # pad-logit bias: exp(pad - max) underflows to exactly 0


def _mlp_kernel(x_ref, w1_ref, b1_ref, w2_ref, b2_ref, w3_ref, b3_ref,
                w4_ref, b4_ref, o_ref):
    """Full forward pass for one batch tile: bf16 matmuls, f32 accumulation."""
    # x arrives in its native dtype (f32 here); cast in-register for the MXU.
    x = x_ref[...].astype(jnp.bfloat16)                            # (bm, 784)

    h = jnp.dot(x, w1_ref[...], preferred_element_type=jnp.float32) + b1_ref[...]
    h = jnp.maximum(h, 0.0)                                        # f32

    h = jnp.dot(h.astype(jnp.bfloat16), w2_ref[...],
                preferred_element_type=jnp.float32) + b2_ref[...]
    h = jnp.maximum(h, 0.0)

    h = jnp.dot(h.astype(jnp.bfloat16), w3_ref[...],
                preferred_element_type=jnp.float32) + b3_ref[...]
    h = jnp.maximum(h, 0.0)

    # Final layer padded to 128 lanes; pad columns have zero weights and a
    # -1e30 bias, so they contribute nothing to the max / logsumexp below.
    logits = jnp.dot(h.astype(jnp.bfloat16), w4_ref[...],
                     preferred_element_type=jnp.float32) + b4_ref[...]

    # log_softmax over the class axis (f32 throughout).
    m = jnp.max(logits, axis=1, keepdims=True)
    shifted = logits - m
    lse = jnp.log(jnp.sum(jnp.exp(shifted), axis=1, keepdims=True))
    o_ref[...] = (shifted - lse).astype(o_ref.dtype)


def _round_up(n, m):
    return (n + m - 1) // m * m


def _choose_bm(batch, bm_max):
    """128-aligned batch tile, clamped to the batch, >=2 grid steps if possible."""
    b_aligned = _round_up(batch, 128)
    want_tiles = 2 if b_aligned >= 256 else 1      # let v7x shard across both TCs
    bm = (b_aligned // want_tiles) // 128 * 128
    return max(128, min(bm_max, bm))


def net_forward(x, params, *, bm_max=1024, out_dtype=jnp.bfloat16,
                padded_output=False):
    """x: (B, 784) f32 (or bf16) -> (B, 10) log-probabilities in `out_dtype`.

    With `padded_output=True`, returns the lane-dense (B, 128) tile and skips
    the wrapper-side slice (the pad lanes hold large-negative log-probs).
    """
    (w1, b1), (w2, b2), (w3, b3), (w4, b4) = params
    B, D = x.shape
    assert D == _IN

    bm = _choose_bm(B, bm_max)
    grid = pl.cdiv(B, bm)   # ragged last tile: OOB rows padded in, dropped out

    # Weights in bf16 (tiny, ~270 KB total); biases as f32 (1, out) rows.
    w1b, w2b, w3b = (w.astype(jnp.bfloat16) for w in (w1, w2, w3))
    b1r, b2r, b3r = (b.reshape(1, -1).astype(jnp.float32) for b in (b1, b2, b3))

    # Lane-dense final layer: pad 10 -> 128 output columns.
    w4p = jnp.zeros((_HID, _OUT_PAD), jnp.bfloat16).at[:, :_OUT].set(
        w4.astype(jnp.bfloat16))
    b4p = jnp.full((1, _OUT_PAD), _NEG, jnp.float32).at[0, :_OUT].set(
        b4.astype(jnp.float32))

    # Constant index_map -> block never changes -> weights stay VMEM-resident.
    full = lambda shape: pl.BlockSpec(shape, lambda i: (0, 0))

    out = pl.pallas_call(
        _mlp_kernel,
        out_shape=jax.ShapeDtypeStruct((B, _OUT_PAD), out_dtype),
        grid_spec=pltpu.PrefetchScalarGridSpec(
            num_scalar_prefetch=0,
            grid=(grid,),
            in_specs=[
                pl.BlockSpec((bm, _IN), lambda i: (i, 0)),   # streamed x tile
                full(w1b.shape), full(b1r.shape),
                full(w2b.shape), full(b2r.shape),
                full(w3b.shape), full(b3r.shape),
                full(w4p.shape), full(b4p.shape),
            ],
            out_specs=pl.BlockSpec((bm, _OUT_PAD), lambda i: (i, 0)),
        ),
        compiler_params=pltpu.CompilerParams(
            dimension_semantics=("parallel",)),
        # NOTE: only if bm_max is pushed past ~2048 (f32 x tiles) does v5e's
        # 16 MiB default scoped VMEM need raising via vmem_limit_bytes; at
        # bm<=1024 the double-buffered working set is ~7.5 MB on every gen.
    )(x, w1b, b1r, w2b, b2r, w3b, b3r, w4p, b4p)

    if padded_output:
        return out
    return out[:, :_OUT]


def init_params(key):
    """Deterministic init mimicking PyTorch Linear default U(-1/sqrt(fan_in), +)."""
    dims = [(_IN, _HID), (_HID, _HID), (_HID, _HID), (_HID, _OUT)]
    params = []
    for (fan_in, fan_out) in dims:
        key, kw, kb = jax.random.split(key, 3)
        bound = 1.0 / (fan_in ** 0.5)
        # Stored as (in, out) == transpose of PyTorch's (out, in) weight.
        w = jax.random.uniform(kw, (fan_in, fan_out), jnp.float32, -bound, bound)
        b = jax.random.uniform(kb, (fan_out,), jnp.float32, -bound, bound)
        params.append((w, b))
    return params


def reference_forward_bf16(x, params):
    """Pure-JAX reference mirroring the kernel's bf16-input / f32-accum math."""
    h = x.astype(jnp.bfloat16)
    for i, (w, b) in enumerate(params):
        h = jnp.dot(h, w.astype(jnp.bfloat16),
                    preferred_element_type=jnp.float32) + b
        if i < len(params) - 1:
            h = jnp.maximum(h, 0.0).astype(jnp.bfloat16)
    return jax.nn.log_softmax(h, axis=1)


def reference_forward_f32(x, params):
    """Pure f32 reference of the original module."""
    h = x
    for i, (w, b) in enumerate(params):
        h = h @ w + b
        if i < len(params) - 1:
            h = jnp.maximum(h, 0.0)
    return jax.nn.log_softmax(h, axis=1)


if __name__ == "__main__":
    key = jax.random.PRNGKey(0)
    kx, kp = jax.random.split(key)

    B = 8  # small example batch; adaptive bm clamps the tile to 128 rows
    x = jax.random.normal(kx, (B, _IN), jnp.float32)
    params = init_params(kp)

    out = net_forward(x, params)
    out = jax.block_until_ready(out)
    assert out.shape == (B, _OUT)
    out_f32 = out.astype(jnp.float32)

    # Tight check vs a reference that mirrors the kernel's bf16/f32 math
    # (kernel output is bf16, so allow ~1 bf16 ulp at log-prob magnitudes).
    ref_bf16 = reference_forward_bf16(x, params)
    assert jnp.allclose(out_f32, ref_bf16, atol=5e-2, rtol=2e-2), \
        "mismatch vs bf16-mirrored JAX reference"

    # Coarse check vs the pure-f32 module semantics (bf16 inputs lose mantissa).
    ref_f32 = reference_forward_f32(x, params)
    assert jnp.allclose(out_f32, ref_f32, atol=0.15, rtol=0.05), \
        "mismatch vs f32 JAX reference"

    print("KERNEL_OK")
</pallas_src>

<mosaic_0001>
module attributes {stable_mosaic.version = 11 : i64} {
  func.func @_mlp_kernel(%arg0: i32, %arg1: memref<128x784xf32, #tpu.memory_space<vmem>>, %arg2: memref<784x64xbf16, #tpu.memory_space<vmem>>, %arg3: memref<1x64xf32, #tpu.memory_space<vmem>>, %arg4: memref<64x64xbf16, #tpu.memory_space<vmem>>, %arg5: memref<1x64xf32, #tpu.memory_space<vmem>>, %arg6: memref<64x64xbf16, #tpu.memory_space<vmem>>, %arg7: memref<1x64xf32, #tpu.memory_space<vmem>>, %arg8: memref<64x128xbf16, #tpu.memory_space<vmem>>, %arg9: memref<1x128xf32, #tpu.memory_space<vmem>>, %arg10: memref<128x128xbf16, #tpu.memory_space<vmem>>) attributes {dimension_semantics = [#tpu.dimension_semantics<parallel>], iteration_bounds = array<i64: 1>, scalar_prefetch = 0 : i64, scratch_operands = 0 : i64, tpu.core_type = #tpu.core_type<tc>, window_params = [{transform_indices = @transform_0, window_bounds = array<i64: 128, 784>}, {pipeline_mode = #tpu.pipeline_mode<synchronous>, transform_indices = @transform_1, window_bounds = array<i64: 784, 64>}, {pipeline_mode = #tpu.pipeline_mode<synchronous>, transform_indices = @transform_2, window_bounds = array<i64: 1, 64>}, {pipeline_mode = #tpu.pipeline_mode<synchronous>, transform_indices = @transform_3, window_bounds = array<i64: 64, 64>}, {pipeline_mode = #tpu.pipeline_mode<synchronous>, transform_indices = @transform_4, window_bounds = array<i64: 1, 64>}, {pipeline_mode = #tpu.pipeline_mode<synchronous>, transform_indices = @transform_5, window_bounds = array<i64: 64, 64>}, {pipeline_mode = #tpu.pipeline_mode<synchronous>, transform_indices = @transform_6, window_bounds = array<i64: 1, 64>}, {pipeline_mode = #tpu.pipeline_mode<synchronous>, transform_indices = @transform_7, window_bounds = array<i64: 64, 128>}, {pipeline_mode = #tpu.pipeline_mode<synchronous>, transform_indices = @transform_8, window_bounds = array<i64: 1, 128>}, {transform_indices = @transform_9, window_bounds = array<i64: 128, 128>}]} {
    %c0 = arith.constant 0 : index
    %c0_0 = arith.constant 0 : index
    %0 = vector.load %arg1[%c0, %c0_0] : memref<128x784xf32, #tpu.memory_space<vmem>>, vector<128x784xf32>
    %1 = arith.truncf %0 : vector<128x784xf32> to vector<128x784xbf16>
    %c0_1 = arith.constant 0 : index
    %c0_2 = arith.constant 0 : index
    %2 = vector.load %arg2[%c0_1, %c0_2] : memref<784x64xbf16, #tpu.memory_space<vmem>>, vector<784x64xbf16>
    %cst = arith.constant dense<0.000000e+00> : vector<128x64xf32>
    %3 = tpu.matmul %1, %2, %cst {dimension_numbers = #tpu.dot_dimension_numbers<[1], [0], [0], [1], [0, 0, 1, 1], [], []>} : vector<128x784xbf16>, vector<784x64xbf16>, vector<128x64xf32> -> vector<128x64xf32>
    %c0_3 = arith.constant 0 : index
    %c0_4 = arith.constant 0 : index
    %4 = vector.load %arg3[%c0_3, %c0_4] : memref<1x64xf32, #tpu.memory_space<vmem>>, vector<1x64xf32>
    %5 = vector.broadcast %4 : vector<1x64xf32> to vector<128x64xf32>
    %6 = arith.addf %3, %5 : vector<128x64xf32>
    %cst_5 = arith.constant 0.000000e+00 : f32
    %7 = vector.broadcast %cst_5 : f32 to vector<128x64xf32>
    %8 = arith.maximumf %6, %7 : vector<128x64xf32>
    %9 = arith.truncf %8 : vector<128x64xf32> to vector<128x64xbf16>
    %c0_6 = arith.constant 0 : index
    %c0_7 = arith.constant 0 : index
    %10 = vector.load %arg4[%c0_6, %c0_7] : memref<64x64xbf16, #tpu.memory_space<vmem>>, vector<64x64xbf16>
    %cst_8 = arith.constant dense<0.000000e+00> : vector<128x64xf32>
    %11 = tpu.matmul %9, %10, %cst_8 {dimension_numbers = #tpu.dot_dimension_numbers<[1], [0], [0], [1], [0, 0, 1, 1], [], []>} : vector<128x64xbf16>, vector<64x64xbf16>, vector<128x64xf32> -> vector<128x64xf32>
    %c0_9 = arith.constant 0 : index
    %c0_10 = arith.constant 0 : index
    %12 = vector.load %arg5[%c0_9, %c0_10] : memref<1x64xf32, #tpu.memory_space<vmem>>, vector<1x64xf32>
    %13 = vector.broadcast %12 : vector<1x64xf32> to vector<128x64xf32>
    %14 = arith.addf %11, %13 : vector<128x64xf32>
    %cst_11 = arith.constant 0.000000e+00 : f32
    %15 = vector.broadcast %cst_11 : f32 to vector<128x64xf32>
    %16 = arith.maximumf %14, %15 : vector<128x64xf32>
    %17 = arith.truncf %16 : vector<128x64xf32> to vector<128x64xbf16>
    %c0_12 = arith.constant 0 : index
    %c0_13 = arith.constant 0 : index
    %18 = vector.load %arg6[%c0_12, %c0_13] : memref<64x64xbf16, #tpu.memory_space<vmem>>, vector<64x64xbf16>
    %cst_14 = arith.constant dense<0.000000e+00> : vector<128x64xf32>
    %19 = tpu.matmul %17, %18, %cst_14 {dimension_numbers = #tpu.dot_dimension_numbers<[1], [0], [0], [1], [0, 0, 1, 1], [], []>} : vector<128x64xbf16>, vector<64x64xbf16>, vector<128x64xf32> -> vector<128x64xf32>
    %c0_15 = arith.constant 0 : index
    %c0_16 = arith.constant 0 : index
    %20 = vector.load %arg7[%c0_15, %c0_16] : memref<1x64xf32, #tpu.memory_space<vmem>>, vector<1x64xf32>
    %21 = vector.broadcast %20 : vector<1x64xf32> to vector<128x64xf32>
    %22 = arith.addf %19, %21 : vector<128x64xf32>
    %cst_17 = arith.constant 0.000000e+00 : f32
    %23 = vector.broadcast %cst_17 : f32 to vector<128x64xf32>
    %24 = arith.maximumf %22, %23 : vector<128x64xf32>
    %25 = arith.truncf %24 : vector<128x64xf32> to vector<128x64xbf16>
    %c0_18 = arith.constant 0 : index
    %c0_19 = arith.constant 0 : index
    %26 = vector.load %arg8[%c0_18, %c0_19] : memref<64x128xbf16, #tpu.memory_space<vmem>>, vector<64x128xbf16>
    %cst_20 = arith.constant dense<0.000000e+00> : vector<128x128xf32>
    %27 = tpu.matmul %25, %26, %cst_20 {dimension_numbers = #tpu.dot_dimension_numbers<[1], [0], [0], [1], [0, 0, 1, 1], [], []>} : vector<128x64xbf16>, vector<64x128xbf16>, vector<128x128xf32> -> vector<128x128xf32>
    %c0_21 = arith.constant 0 : index
    %c0_22 = arith.constant 0 : index
    %28 = vector.load %arg9[%c0_21, %c0_22] : memref<1x128xf32, #tpu.memory_space<vmem>>, vector<1x128xf32>
    %29 = vector.broadcast %28 : vector<1x128xf32> to vector<128x128xf32>
    %30 = arith.addf %27, %29 : vector<128x128xf32>
    %cst_23 = arith.constant dense<0xFF800000> : vector<128xf32>
    %31 = vector.multi_reduction <maximumf>, %30, %cst_23 [1] : vector<128x128xf32> to vector<128xf32>
    %32 = vector.shape_cast %31 : vector<128xf32> to vector<128x1xf32>
    %33 = vector.broadcast %32 : vector<128x1xf32> to vector<128x128xf32>
    %34 = arith.subf %30, %33 : vector<128x128xf32>
    %35 = math.exp %34 : vector<128x128xf32>
    %cst_24 = arith.constant dense<0.000000e+00> : vector<128xf32>
    %36 = vector.multi_reduction <add>, %35, %cst_24 [1] : vector<128x128xf32> to vector<128xf32>
    %37 = vector.shape_cast %36 : vector<128xf32> to vector<128x1xf32>
    %38 = math.log %37 : vector<128x1xf32>
    %39 = vector.broadcast %38 : vector<128x1xf32> to vector<128x128xf32>
    %40 = arith.subf %34, %39 : vector<128x128xf32>
    %41 = arith.truncf %40 : vector<128x128xf32> to vector<128x128xbf16>
    %c0_25 = arith.constant 0 : index
    %c0_26 = arith.constant 0 : index
    %42 = vector.load %arg10[%c0_25, %c0_26] : memref<128x128xbf16, #tpu.memory_space<vmem>>, vector<128x128xbf16>
    tpu.vector_store %arg10[%c0_25, %c0_26], %41 {strides = array<i32>} : memref<128x128xbf16, #tpu.memory_space<vmem>>, vector<128x128xbf16>,
    return
  }
  func.func @transform_0(%arg0: i32) -> (i32, i32) {
    %c0_i32 = arith.constant 0 : i32
    %c0_i32_0 = arith.constant 0 : i32
    return %arg0, %c0_i32 : i32, i32
  }
  func.func @transform_1(%arg0: i32) -> (i32, i32) {
    %c0_i32 = arith.constant 0 : i32
    %c0_i32_0 = arith.constant 0 : i32
    %c0_i32_1 = arith.constant 0 : i32
    return %c0_i32, %c0_i32_0 : i32, i32
  }
  func.func @transform_2(%arg0: i32) -> (i32, i32) {
    %c0_i32 = arith.constant 0 : i32
    %c0_i32_0 = arith.constant 0 : i32
    %c0_i32_1 = arith.constant 0 : i32
    return %c0_i32, %c0_i32_0 : i32, i32
  }
  func.func @transform_3(%arg0: i32) -> (i32, i32) {
    %c0_i32 = arith.constant 0 : i32
    %c0_i32_0 = arith.constant 0 : i32
    %c0_i32_1 = arith.constant 0 : i32
    return %c0_i32, %c0_i32_0 : i32, i32
  }
  func.func @transform_4(%arg0: i32) -> (i32, i32) {
    %c0_i32 = arith.constant 0 : i32
    %c0_i32_0 = arith.constant 0 : i32
    %c0_i32_1 = arith.constant 0 : i32
    return %c0_i32, %c0_i32_0 : i32, i32
  }
  func.func @transform_5(%arg0: i32) -> (i32, i32) {
    %c0_i32 = arith.constant 0 : i32
    %c0_i32_0 = arith.constant 0 : i32
    %c0_i32_1 = arith.constant 0 : i32
    return %c0_i32, %c0_i32_0 : i32, i32
  }
  func.func @transform_6(%arg0: i32) -> (i32, i32) {
    %c0_i32 = arith.constant 0 : i32
    %c0_i32_0 = arith.constant 0 : i32
    %c0_i32_1 = arith.constant 0 : i32
    return %c0_i32, %c0_i32_0 : i32, i32
  }
  func.func @transform_7(%arg0: i32) -> (i32, i32) {
    %c0_i32 = arith.constant 0 : i32
    %c0_i32_0 = arith.constant 0 : i32
    %c0_i32_1 = arith.constant 0 : i32
    return %c0_i32, %c0_i32_0 : i32, i32
  }
  func.func @transform_8(%arg0: i32) -> (i32, i32) {
    %c0_i32 = arith.constant 0 : i32
    %c0_i32_0 = arith.constant 0 : i32
    %c0_i32_1 = arith.constant 0 : i32
    return %c0_i32, %c0_i32_0 : i32, i32
  }
  func.func @transform_9(%arg0: i32) -> (i32, i32) {
    %c0_i32 = arith.constant 0 : i32
    %c0_i32_0 = arith.constant 0 : i32
    return %arg0, %c0_i32 : i32, i32
  }
}

</mosaic_0001>

<bundles_post_ra>
// kernel: tpu_custom_call.1
= control target key start
LH: loop header
LB: loop body
LE: loop exit
PB: predicated region body
PF: predicated region fallthrough
CT: control target
= control target key end

     0   :  { %14 = vsyncpa [#allocation3], 0  ;;  %vm601_vm0 = vcmask 130048   ;;  %vm1077_vm1 = vcmask 523264   ;;  %s3271_s0 = inlined_call_operand.vmem [shape: f32[8,784], index: 0, kind: input, shape index: {}]   ;;  %s3272_s1 = inlined_call_operand.vmem [shape: bf16[784,64], index: 1, kind: input, shape index: {}]   ;;  %s3273_s2 = inlined_call_operand.vmem [shape: f32[1,64], index: 2, kind: input, shape index: {}]   ;;  %s3274_s3 = inlined_call_operand.vmem [shape: bf16[64,64], index: 3, kind: input, shape index: {}]   ;;  %s3275_s4 = inlined_call_operand.vmem [shape: f32[1,64], index: 4, kind: input, shape index: {}]   ;;  %s3276_s5 = inlined_call_operand.vmem [shape: bf16[64,64], index: 5, kind: input, shape index: {}]   ;;  %s3277_s6 = inlined_call_operand.vmem [shape: f32[1,64], index: 6, kind: input, shape index: {}]   ;;  %s3278_s7 = inlined_call_operand.vmem [shape: bf16[64,128], index: 7, kind: input, shape index: {}]   ;;  %s3279_s8 = inlined_call_operand.vmem [shape: f32[1,128], index: 8, kind: input, shape index: {}]   ;;  %s3280_s9 = inlined_call_operand.hbm [shape: bf16[8,128], index: 9, kind: output, shape index: {}]  }
   0x1   :  { %v2329_v0 = vld [vmem:[%s3272_s1 + $0x40] sm:$0xff]   ;;  %v2333_v4 = vld [vmem:[%s3272_s1 + $0x48] sm:$0xff]   ;;  %v2337_v8 = vld [vmem:[%s3272_s1 + $0x50] sm:$0xff]  }
   0x2   :  { %v2330_v1 = vld [vmem:[%s3272_s1] sm:$0xff]   ;;  %1999 = vmatprep.subr.bf16.mxu0 %v2329_v0  ;;  %v2334_v5 = vld [vmem:[%s3272_s1 + $0x8] sm:$0xff]   ;;  %v2338_v9 = vld [vmem:[%s3272_s1 + $0x10] sm:$0xff]  }
   0x3   :  { %v2331_v2 = vld [vmem:[%s3272_s1 + $0xc0] sm:$0xff]   ;;  %2000 = vmatpush3.bf16.msra.mxu0 %v2330_v1  ;;  %v2335_v6 = vld [vmem:[%s3272_s1 + $0xc8] sm:$0xff]   ;;  %v2339_v10 = vld [vmem:[%s3272_s1 + $0xd0] sm:$0xff]  }
   0x4   :  { %v2332_v3 = vld [vmem:[%s3272_s1 + $0x80] sm:$0xff]   ;;  %2063 = vmatprep.subr.bf16.mxu1 %v2331_v2  ;;  %2001 = vmatprep.subr.bf16.mxu0 %v2333_v4  ;;  %v2336_v7 = vld [vmem:[%s3272_s1 + $0x88] sm:$0xff]   ;;  %v2340_v11 = vld [vmem:[%s3272_s1 + $0x90] sm:$0xff]  }
   0x5   :  { %2064 = vmatpush3.bf16.msra.mxu1 %v2332_v3  ;;  %v2341_v12 = vld [vmem:[%s3272_s1 + $0x58] sm:$0xff]   ;;  %v2345_v16 = vld [vmem:[%s3272_s1 + $0x60] sm:$0xff]   ;;  %v2349_v20 = vld [vmem:[%s3272_s1 + $0x68] sm:$0xff]  }
   0x6   :  { %2065 = vmatprep.subr.bf16.mxu1 %v2335_v6  ;;  %v2342_v13 = vld [vmem:[%s3272_s1 + $0x18] sm:$0xff]   ;;  %v2346_v17 = vld [vmem:[%s3272_s1 + $0x20] sm:$0xff]   ;;  %v2350_v21 = vld [vmem:[%s3272_s1 + $0x28] sm:$0xff]  }
   0x7   :  { %2002 = vmatpush3.bf16.msra.mxu0 %v2334_v5  ;;  %v2343_v14 = vld [vmem:[%s3272_s1 + $0xd8] sm:$0xff]   ;;  %v2347_v18 = vld [vmem:[%s3272_s1 + $0xe0] sm:$0xff]   ;;  %v2351_v22 = vld [vmem:[%s3272_s1 + $0xe8] sm:$0xff]  }
   0x8   :  { %2003 = vmatprep.subr.bf16.mxu0 %v2337_v8  ;;  %v2344_v15 = vld [vmem:[%s3272_s1 + $0x98] sm:$0xff]   ;;  %v2348_v19 = vld [vmem:[%s3272_s1 + $0xa0] sm:$0xff]   ;;  %v2352_v23 = vld [vmem:[%s3272_s1 + $0xa8] sm:$0xff]  }
   0x9   :  { %2066 = vmatpush3.bf16.msra.mxu1 %v2336_v7  ;;  %v2353_v24 = vld [vmem:[%s3272_s1 + $0x70] sm:$0xff]   ;;  %v2357_v28 = vld [vmem:[%s3272_s1 + $0x78] sm:$0xff]   ;;  %v35_v31 = vld [vmem:[%s3271_s0 + $0x8] sm:$0xff] }
   0xa   :  { %2067 = vmatprep.subr.bf16.mxu1 %v2339_v10  ;;  %v2354_v25 = vld [vmem:[%s3272_s1 + $0x30] sm:$0xff]   ;;  %v2358_v29 = vld [vmem:[%s3272_s1 + $0x38] sm:$0xff]   ;;  %v42_v32 = vld [vmem:[%s3271_s0 + $0x40] sm:$0xff] }
   0xb   :  { %2004 = vmatpush3.bf16.msra.mxu0 %v2338_v9  ;;  %v2355_v26 = vld [vmem:[%s3272_s1 + $0xf0] sm:$0xff]   ;;  %v2359_v30 = vld [vmem:[%s3272_s1 + $0xf8] sm:$0xff]   ;;  %v147_v33 = vpack.c.bf16 %v42_v32, %v35_v31  ;;  %v34_v35 = vld [vmem:[%s3271_s0] sm:$0xff] }
   0xc   :  { %2005 = vmatprep.subr.bf16.mxu0 %v2341_v12  ;;  %v2356_v27 = vld [vmem:[%s3272_s1 + $0xb0] sm:$0xff]   ;;  %v2360_v34 = vld [vmem:[%s3272_s1 + $0xb8] sm:$0xff]   ;;  %v2361_v38 = vld [vmem:[%s3272_s1 + $0x140] sm:$0xff]  }
   0xd   :  { %2068 = vmatpush3.bf16.msra.mxu1 %v2340_v11  ;;  %v41_v36 = vld [vmem:[%s3271_s0 + $0x38] sm:$0xff]  ;;  %658 = vmatprep.mubr.bf16.mxu0 %v147_v33  ;;  %v44_v40 = vld [vmem:[%s3271_s0 + $0x50] sm:$0xff]  ;;  %v2362_v42 = vld [vmem:[%s3272_s1 + $0x100] sm:$0xff]  }
   0xe   :  { %2069 = vmatprep.subr.bf16.mxu1 %v2343_v14  ;;  %v146_v37 = vpack.c.bf16 %v41_v36, %v34_v35  ;;  %v37_v39 = vld [vmem:[%s3271_s0 + $0x18] sm:$0xff]  ;;  %v36_v43 = vld [vmem:[%s3271_s0 + $0x10] sm:$0xff]  ;;  %v43_v44 = vld [vmem:[%s3271_s0 + $0x48] sm:$0xff] }
   0xf   :  { %2006 = vmatpush3.bf16.msra.mxu0 %v2342_v13  ;;  %v149_v41 = vpack.c.bf16 %v44_v40, %v37_v39  ;;  %v148_v45 = vpack.c.bf16 %v43_v44, %v36_v43  ;;  %v49_v46 = vld [vmem:[%s3271_s0 + $0x78] sm:$0xff]  ;;  %v56_v47 = vld [vmem:[%s3271_s0 + $0xb0] sm:$0xff]  ;;  %v55_v50 = vld [vmem:[%s3271_s0 + $0xa8] sm:$0xff] }
  0x10   :  { %2007 = vmatprep.subr.bf16.mxu0 %v2345_v16  ;;  %v48_v48 = vld [vmem:[%s3271_s0 + $0x70] sm:$0xff]  ;;  %v154_v49 = vpack.c.bf16 %v56_v47, %v49_v46  ;;  %v2363_v51 = vld [vmem:[%s3272_s1 + $0x148] sm:$0xff]   ;;  %v58_v53 = vld [vmem:[%s3271_s0 + $0xc0] sm:$0xff] }
  0x11   :  { %2070 = vmatpush3.bf16.msra.mxu1 %v2344_v15  ;;  %755 = vmatprep.mubr.bf16.mxu1 %v149_v41  ;;  %v51_v52 = vld [vmem:[%s3271_s0 + $0x88] sm:$0xff]  ;;  %v153_v54 = vpack.c.bf16 %v55_v50, %v48_v48  ;;  %v50_v57 = vld [vmem:[%s3271_s0 + $0x80] sm:$0xff]  ;;  %v57_v58 = vld [vmem:[%s3271_s0 + $0xb8] sm:$0xff] }
  0x12   :  { %2071 = vmatprep.subr.bf16.mxu1 %v2347_v18  ;;  %v156_v55 = vpack.c.bf16 %v58_v53, %v51_v52  ;;  %v2364_v56 = vld [vmem:[%s3272_s1 + $0x108] sm:$0xff]   ;;  %v70_v60 = vld [vmem:[%s3271_s0 + $0x120] sm:$0xff]  ;;  %v155_v61 = vpack.c.bf16 %v57_v58, %v50_v57  ;;  %v2365_v0 = vld [vmem:[%s3272_s1 + $0x150] sm:$0xff]  }
  0x13   :  { %2008 = vmatpush3.bf16.msra.mxu0 %v2346_v17  ;;  %v63_v59 = vld [vmem:[%s3271_s0 + $0xe8] sm:$0xff]  ;;  %v62_v63 = vld [vmem:[%s3271_s0 + $0xe0] sm:$0xff]  ;;  %v65_v1 = vld [vmem:[%s3271_s0 + $0xf8] sm:$0xff] }
  0x14   :  { %2009 = vmatprep.subr.bf16.mxu0 %v2349_v20  ;;  %v161_v62 = vpack.c.bf16 %v70_v60, %v63_v59  ;;  %v72_v2 = vld [vmem:[%s3271_s0 + $0x130] sm:$0xff]  ;;  %v69_v3 = vld [vmem:[%s3271_s0 + $0x118] sm:$0xff]  ;;  %v71_v9 = vld [vmem:[%s3271_s0 + $0x128] sm:$0xff] }
  0x15   :  { %2072 = vmatpush3.bf16.msra.mxu1 %v2348_v19  ;;  %v163_v4 = vpack.c.bf16 %v72_v2, %v65_v1  ;;  %v2366_v5 = vld [vmem:[%s3272_s1 + $0x110] sm:$0xff]   ;;  %v77_v6 = vld [vmem:[%s3271_s0 + $0x158] sm:$0xff]  ;;  %v160_v10 = vpack.c.bf16 %v69_v3, %v62_v63  ;;  %v79_v12 = vld [vmem:[%s3271_s0 + $0x168] sm:$0xff] }
  0x16   :  { %2073 = vmatprep.subr.bf16.mxu1 %v2351_v22  ;;  %v84_v7 = vld [vmem:[%s3271_s0 + $0x190] sm:$0xff]  ;;  %v2367_v11 = vld [vmem:[%s3272_s1 + $0x158] sm:$0xff]   ;;  %v86_v14 = vld [vmem:[%s3271_s0 + $0x1a0] sm:$0xff] }
  0x17   :  { %2010 = vmatpush3.bf16.msra.mxu0 %v2350_v21  ;;  %v64_v8 = vld [vmem:[%s3271_s0 + $0xf0] sm:$0xff]  ;;  %v168_v13 = vpack.c.bf16 %v84_v7, %v77_v6  ;;  %v2368_v15 = vld [vmem:[%s3272_s1 + $0x118] sm:$0xff]   ;;  %v83_v18 = vld [vmem:[%s3271_s0 + $0x188] sm:$0xff]  ;;  %v170_v19 = vpack.c.bf16 %v86_v14, %v79_v12 }
  0x18   :  { %2011 = vmatprep.subr.bf16.mxu0 %v2353_v24  ;;  %v162_v16 = vpack.c.bf16 %v71_v9, %v64_v8  ;;  %v76_v17 = vld [vmem:[%s3271_s0 + $0x150] sm:$0xff]  ;;  %v91_v20 = vld [vmem:[%s3271_s0 + $0x1c8] sm:$0xff]  ;;  %v98_v21 = vld [vmem:[%s3271_s0 + $0x200] sm:$0xff] }
  0x19   :  { %2074 = vmatpush3.bf16.msra.mxu1 %v2352_v23  ;;  %v2369_v22 = vld [vmem:[%s3272_s1 + $0x160] sm:$0xff]   ;;  %v2372_v31 = vld [vmem:[%s3272_s1 + $0x168] sm:$0xff]   ;;  %v97_v36 = vld [vmem:[%s3271_s0 + $0x1f8] sm:$0xff] }
  0x1a   :  { %2075 = vmatprep.subr.bf16.mxu1 %v2355_v26  ;;  %v2370_v23 = vld [vmem:[%s3272_s1 + $0x120] sm:$0xff]   ;;  %v85_v26 = vld [vmem:[%s3271_s0 + $0x198] sm:$0xff]  ;;  %v92_v39 = vld [vmem:[%s3271_s0 + $0x1d0] sm:$0xff] }
  0x1b   :  { %2012 = vmatpush3.bf16.msra.mxu0 %v2354_v25  ;;  %v78_v24 = vld [vmem:[%s3271_s0 + $0x160] sm:$0xff]  ;;  %v167_v25 = vpack.c.bf16 %v83_v18, %v76_v17  ;;  %v2374_v40 = vld [vmem:[%s3272_s1 + $0x170] sm:$0xff]   ;;  %v107_v44 = vld [vmem:[%s3271_s0 + $0x248] sm:$0xff] }
  0x1c   :  { %2013 = vmatprep.subr.bf16.mxu0 %v2357_v28  ;;  %v175_v28 = vpack.c.bf16 %v98_v21, %v91_v20  ;;  %v169_v32 = vpack.c.bf16 %v85_v26, %v78_v24  ;;  %v90_v35 = vld [vmem:[%s3271_s0 + $0x1c0] sm:$0xff]  ;;  %v2375_v46 = vld [vmem:[%s3272_s1 + $0x130] sm:$0xff]   ;;  %v2377_v52 = vld [vmem:[%s3272_s1 + $0x138] sm:$0xff]  }
  0x1d   :  { %2076 = vmatpush3.bf16.msra.mxu1 %v2356_v27  ;;  %v2371_v27 = vld [vmem:[%s3272_s1 + $0x180] sm:$0xff]   ;;  %v174_v41 = vpack.c.bf16 %v97_v36, %v90_v35  ;;  %v104_v48 = vld [vmem:[%s3271_s0 + $0x230] sm:$0xff]  ;;  %v119_v53 = vld [vmem:[%s3271_s0 + $0x2a8] sm:$0xff] }
  0x1e   :  { %2077 = vmatprep.subr.bf16.mxu1 %v2359_v30  ;;  %v100_v30 = vld [vmem:[%s3271_s0 + $0x210] sm:$0xff]  ;;  %v113_v57 = vld [vmem:[%s3271_s0 + $0x278] sm:$0xff]  ;;  %v118_v63 = vld [vmem:[%s3271_s0 + $0x2a0] sm:$0xff] }
  0x1f   :  { %2014 = vmatpush3.bf16.msra.mxu0 %v2358_v29  ;;  %v93_v29 = vld [vmem:[%s3271_s0 + $0x1d8] sm:$0xff]  ;;  %v128_v60 = vld [vmem:[%s3271_s0 + $0x2f0] sm:$0xff]  ;;  %v135_v7 = vld [vmem:[%s3271_s0 + $0x328] sm:$0xff] }
  0x20   :  { %2127 = vmatprep.subr.bf16.mxu0 %v2361_v38  ;;  %v177_v33 = vpack.c.bf16 %v100_v30, %v93_v29  ;;  %v112_v38 = vld [vmem:[%s3271_s0 + $0x270] sm:$0xff]  ;;  %v121_v59 = vld [vmem:[%s3271_s0 + $0x2b8] sm:$0xff]  ;;  %v142_v8 = vld [vmem:[%s3271_s0 + $0x360] sm:$0xff] }
  0x21   :  { %2078 = vmatpush3.bf16.msra.mxu1 %v2360_v34  ;;  %v2373_v34 = vld [vmem:[%s3272_s1 + $0x128] sm:$0xff]   ;;  %v133_v1 = vld [vmem:[%s3271_s0 + $0x318] sm:$0xff]  ;;  %v140_v2 = vld [vmem:[%s3271_s0 + $0x350] sm:$0xff] }
  0x22   :  { %659 = vmatmul.mubr.bf16.vlgmr.msra.gmra.mrb[0].mxu0 %v146_v37  ;;  %2236 = vmatprep.subr.bf16.mxu1 %v2371_v27  ;;  %v105_v37 = vld [vmem:[%s3271_s0 + $0x238] sm:$0xff]  ;;  %v196_v6 = vpack.c.bf16 %v140_v2, %v133_v1  ;;  %v139_v12 = vld [vmem:[%s3271_s0 + $0x348] sm:$0xff]  ;;  %v40_v17 = vld [vmem:[%s3271_s0 + $0x30] sm:$0xff] }
  0x23   :  { %2128 = vmatpush3.bf16.msra.mxu0 %v2362_v42  ;;  %666 = vmatprep.mubr.bf16.mxu0 %v154_v49  ;;  %v99_v42 = vld [vmem:[%s3271_s0 + $0x208] sm:$0xff]  ;;  %v182_v43 = vpack.c.bf16 %v112_v38, %v105_v37  ;;  %v141_v14 = vld [vmem:[%s3271_s0 + $0x358] sm:$0xff]  ;;  %v60_v26 = vld [vmem:[%s3271_s0 + $0xd0] sm:$0xff] }
  0x24   :  { %756 = vmatmul.mubr.bf16.vlgmr.msra.gmra.mrb[0].mxu1 %v148_v45  ;;  %2129 = vmatprep.subr.bf16.mxu0 %v2363_v51  ;;  %v114_v45 = vld [vmem:[%s3271_s0 + $0x280] sm:$0xff]  ;;  %v176_v47 = vpack.c.bf16 %v99_v42, %v92_v39  ;;  %v111_v49 = vld [vmem:[%s3271_s0 + $0x268] sm:$0xff]  ;;  %v2376_v51 = vld [vmem:[%s3272_s1 + $0x178] sm:$0xff]  }
  0x25   :  { %763 = vmatprep.mubr.bf16.mxu1 %v156_v55  ;;  %2237 = vmatpush3.bf16.msra.mxu1 %v2371_v27  ;;  %v184_v50 = vpack.c.bf16 %v114_v45, %v107_v44  ;;  %v181_v55 = vpack.c.bf16 %v111_v49, %v104_v48  ;;  %v47_v18 = vld [vmem:[%s3271_s0 + $0x68] sm:$0xff]  ;;  %v61_v29 = vld [vmem:[%s3271_s0 + $0xd8] sm:$0xff]  ;;  %v52_v35 = vld [vmem:[%s3271_s0 + $0x90] sm:$0xff] }
  0x26   :  { %v152_v24 = vpack.c.bf16 %v47_v18, %v40_v17  ;;  %v59_v36 = vld [vmem:[%s3271_s0 + $0xc8] sm:$0xff]  ;;  %v74_v38 = vld [vmem:[%s3271_s0 + $0x140] sm:$0xff]  ;;  %v73_v48 = vld [vmem:[%s3271_s0 + $0x138] sm:$0xff] }
  0x27   :  { %2130 = vmatpush3.bf16.msra.mxu0 %v2364_v56  ;;  %v106_v56 = vld [vmem:[%s3271_s0 + $0x240] sm:$0xff]  ;;  %v67_v37 = vld [vmem:[%s3271_s0 + $0x108] sm:$0xff]  ;;  %v157_v39 = vpack.c.bf16 %v59_v36, %v52_v35  ;;  %v81_v49 = vld [vmem:[%s3271_s0 + $0x178] sm:$0xff] }
  0x28   :  { %2131 = vmatprep.subr.bf16.mxu0 %v2365_v0  ;;  %v125_v0 = vld [vmem:[%s3271_s0 + $0x2d8] sm:$0xff]  ;;  %v165_v42 = vpack.c.bf16 %v74_v38, %v67_v37  ;;  %v103_v44 = vld [vmem:[%s3271_s0 + $0x228] sm:$0xff] }
  0x29   :  { %v188_v3 = vpack.c.bf16 %v125_v0, %v118_v63  ;;  %v138_v0 = vld [vmem:[%s3271_s0 + $0x340] sm:$0xff]  ;;  %v145_v1 = vld [vmem:[%s3271_s0 + $0x378] sm:$0xff] }
  0x2a   :  { %667 = vmatmul.mubr.bf16.gmra.mrb[4].mxu0 %v153_v54  ;;  %v126_v54 = vld [vmem:[%s3271_s0 + $0x2e0] sm:$0xff]  ;;  %v129_v17 = vld [vmem:[%s3271_s0 + $0x2f8] sm:$0xff] }
  0x2b   :  { %674 = vmatprep.mubr.bf16.mxu0 %v161_v62  ;;  %2132 = vmatpush3.bf16.msra.mxu0 %v2366_v5  ;;  %v189_v58 = vpack.c.bf16 %v126_v54, %v119_v53  ;;  %v191_v62 = vpack.c.bf16 %v128_v60, %v121_v59  ;;  %v127_v5 = vld [vmem:[%s3271_s0 + $0x2e8] sm:$0xff]  ;;  %v117_v53 = vld [vmem:[%s3271_s0 + $0x298] sm:$0xff]  ;;  %v80_v59 = vld [vmem:[%s3271_s0 + $0x170] sm:$0xff] }
  0x2c   :  { %764 = vmatmul.mubr.bf16.gmra.mrb[4].mxu1 %v155_v61  ;;  %2133 = vmatprep.subr.bf16.mxu0 %v2367_v11  ;;  %v183_v61 = vpack.c.bf16 %v113_v57, %v106_v56  ;;  %v132_v11 = vld [vmem:[%s3271_s0 + $0x310] sm:$0xff]  ;;  %v131_v56 = vld [vmem:[%s3271_s0 + $0x308] sm:$0xff]  ;;  %v137_v18 = vld [vmem:[%s3271_s0 + $0x338] sm:$0xff] }
  0x2d   :  { %771 = vmatprep.mubr.bf16.mxu1 %v163_v4  ;;  %v120_v4 = vld [vmem:[%s3271_s0 + $0x2b0] sm:$0xff]  ;;  %v87_v60 = vld [vmem:[%s3271_s0 + $0x1a8] sm:$0xff] }
  0x2e   :  { %v190_v9 = vpack.c.bf16 %v127_v5, %v120_v4  ;;  %v171_v63 = vpack.c.bf16 %v87_v60, %v80_v59  ;;  %v94_v4 = vld [vmem:[%s3271_s0 + $0x1e0] sm:$0xff]  ;;  %v101_v5 = vld [vmem:[%s3271_s0 + $0x218] sm:$0xff] }
  0x2f   :  { %2134 = vmatpush3.bf16.msra.mxu0 %v2368_v15  ;;  %v39_v15 = vld [vmem:[%s3271_s0 + $0x28] sm:$0xff] }
  0x30   :  { %2135 = vmatprep.subr.bf16.mxu0 %v2369_v22  ;;  %v38_v22 = vld [vmem:[%s3271_s0 + $0x20] sm:$0xff] }
  0x32   :  { %675 = vmatmul.mubr.bf16.gmra.mrb[8].mxu0 %v160_v10  ;;  %v198_v10 = vpack.c.bf16 %v142_v8, %v135_v7  ;;  %v116_v7 = vld [vmem:[%s3271_s0 + $0x290] sm:$0xff]  ;;  %v178_v8 = vpack.c.bf16 %v101_v5, %v94_v4 }
  0x33   :  { %682 = vmatprep.mubr.bf16.mxu0 %v168_v13  ;;  %2136 = vmatpush3.bf16.msra.mxu0 %v2370_v23  ;;  %v134_v13 = vld [vmem:[%s3271_s0 + $0x320] sm:$0xff]  ;;  %v45_v23 = vld [vmem:[%s3271_s0 + $0x58] sm:$0xff] }
  0x34   :  { %772 = vmatmul.mubr.bf16.gmra.mrb[8].mxu1 %v162_v16  ;;  %2137 = vmatprep.subr.bf16.mxu0 %v2372_v31  ;;  %v46_v16 = vld [vmem:[%s3271_s0 + $0x60] sm:$0xff]  ;;  %v197_v21 = vpack.c.bf16 %v141_v14, %v134_v13  ;;  %v150_v27 = vpack.c.bf16 %v45_v23, %v38_v22  ;;  %v68_v31 = vld [vmem:[%s3271_s0 + $0x110] sm:$0xff]  ;;  %v143_v23 = vld [vmem:[%s3271_s0 + $0x368] sm:$0xff] }
  0x35   :  { %779 = vmatprep.mubr.bf16.mxu1 %v170_v19  ;;  %v195_v19 = vpack.c.bf16 %v139_v12, %v132_v11  ;;  %v151_v20 = vpack.c.bf16 %v46_v16, %v39_v15  ;;  %v115_v11 = vld [vmem:[%s3271_s0 + $0x288] sm:$0xff]  ;;  %v130_v13 = vld [vmem:[%s3271_s0 + $0x300] sm:$0xff]  ;;  %v136_v22 = vld [vmem:[%s3271_s0 + $0x330] sm:$0xff] }
  0x36   :  { %v123_v12 = vld [vmem:[%s3271_s0 + $0x2c8] sm:$0xff]  ;;  %v122_v16 = vld [vmem:[%s3271_s0 + $0x2c0] sm:$0xff] }
  0x37   :  { %2138 = vmatpush3.bf16.msra.mxu0 %v2373_v34  ;;  %v193_v15 = vpack.c.bf16 %v130_v13, %v123_v12 }
  0x38   :  { %2139 = vmatprep.subr.bf16.mxu0 %v2374_v40  ;;  %v82_v40 = vld [vmem:[%s3271_s0 + $0x180] sm:$0xff] }
  0x3a   :  { %683 = vmatmul.mubr.bf16.gmra.mrb[12].mxu0 %v167_v25  ;;  %v53_v25 = vld [vmem:[%s3271_s0 + $0x98] sm:$0xff] }
  0x3b   :  { %690 = vmatprep.mubr.bf16.mxu0 %v175_v28  ;;  %2140 = vmatpush3.bf16.msra.mxu0 %v2375_v46  ;;  %v54_v28 = vld [vmem:[%s3271_s0 + $0xa0] sm:$0xff]  ;;  %v158_v30 = vpack.c.bf16 %v60_v26, %v53_v25  ;;  %v2379_v26 = vld [vmem:[%s3274_s3 + $0x8] sm:$0xff]  }
  0x3c   :  { %780 = vmatmul.mubr.bf16.gmra.mrb[12].mxu1 %v169_v32  ;;  %2141 = vmatprep.subr.bf16.mxu0 %v2376_v51  ;;  %v75_v32 = vld [vmem:[%s3271_s0 + $0x148] sm:$0xff]  ;;  %v2378_v25 = vld [vmem:[%s3274_s3] sm:$0xff]  }
  0x3d   :  { %787 = vmatprep.mubr.bf16.mxu1 %v177_v33  ;;  %v159_v33 = vpack.c.bf16 %v61_v29, %v54_v28  ;;  %v166_v34 = vpack.c.bf16 %v75_v32, %v68_v31  ;;  %2254 = vmatprep.subr.bf16.mxu1 %v2378_v25  ;;  %v2381_v28 = vld [vmem:[%s3274_s3 + $0x18] sm:$0xff]  }
  0x3f   :  { %2142 = vmatpush3.bf16.msra.mxu0 %v2377_v52  ;;  %v110_v52 = vld [vmem:[%s3271_s0 + $0x260] sm:$0xff] }
  0x40   :  { %v187_v57 = vpack.c.bf16 %v117_v53, %v110_v52 }
  0x42   :  { %691 = vmatmul.mubr.bf16.gmra.mrb[16].mxu0 %v174_v41  ;;  %v89_v41 = vld [vmem:[%s3271_s0 + $0x1b8] sm:$0xff] }
  0x43   :  { %698 = vmatprep.mubr.bf16.mxu0 %v182_v43  ;;  %v96_v43 = vld [vmem:[%s3271_s0 + $0x1f0] sm:$0xff]  ;;  %v173_v45 = vpack.c.bf16 %v89_v41, %v82_v40 }
  0x44   :  { %788 = vmatmul.mubr.bf16.gmra.mrb[16].mxu1 %v176_v47  ;;  %v180_v46 = vpack.c.bf16 %v103_v44, %v96_v43  ;;  %v66_v47 = vld [vmem:[%s3271_s0 + $0x100] sm:$0xff]  ;;  %v2383_v44 = vld [vmem:[%s3276_s5 + $0x8] sm:$0xff]  }
  0x45   :  { %795 = vmatprep.mubr.bf16.mxu1 %v184_v50  ;;  %v88_v50 = vld [vmem:[%s3271_s0 + $0x1b0] sm:$0xff]  ;;  %v164_v51 = vpack.c.bf16 %v73_v48, %v66_v47  ;;  %v2382_v43 = vld [vmem:[%s3276_s5] sm:$0xff]  }
  0x46   :  { %v172_v54 = vpack.c.bf16 %v88_v50, %v81_v49  ;;  %2278 = vmatprep.subr.bf16.mxu0 %v2382_v43 }
  0x4a   :  { %699 = vmatmul.mubr.bf16.gmra.mrb[20].mxu0 %v181_v55  ;;  %v124_v55 = vld [vmem:[%s3271_s0 + $0x2d0] sm:$0xff] }
  0x4b   :  { %706 = vmatprep.mubr.bf16.mxu0 %v189_v58  ;;  %v194_v58 = vpack.c.bf16 %v131_v56, %v124_v55 }
  0x4c   :  { %796 = vmatmul.mubr.bf16.gmra.mrb[20].mxu1 %v183_v61  ;;  %v95_v61 = vld [vmem:[%s3271_s0 + $0x1e8] sm:$0xff] }
  0x4d   :  { %803 = vmatprep.mubr.bf16.mxu1 %v191_v62  ;;  %v102_v62 = vld [vmem:[%s3271_s0 + $0x220] sm:$0xff] }
  0x4e   :  { %v179_v2 = vpack.c.bf16 %v102_v62, %v95_v61 }
  0x52   :  { %707 = vmatmul.mubr.bf16.gmra.mrb[24].mxu0 %v188_v3  ;;  %v201_v3 = vpack.c.bf16 %v145_v1, %v138_v0 }
  0x53   :  { %714 = vmatprep.mubr.bf16.mxu0 %v196_v6  ;;  %v109_v6 = vld [vmem:[%s3271_s0 + $0x258] sm:$0xff] }
  0x54   :  { %804 = vmatmul.mubr.bf16.gmra.mrb[24].mxu1 %v190_v9  ;;  %v186_v9 = vpack.c.bf16 %v116_v7, %v109_v6 }
  0x55   :  { %811 = vmatprep.mubr.bf16.mxu1 %v198_v10  ;;  %v108_v10 = vld [vmem:[%s3271_s0 + $0x250] sm:$0xff] }
  0x56   :  { %v185_v14 = vpack.c.bf16 %v115_v11, %v108_v10 }
  0x5a   :  { %715 = vmatmul.mubr.bf16.gmra.mrb[28].mxu0 %v195_v19  ;;  %v144_v19 = vld [vmem:[%s3271_s0 + $0x370] sm:$0xff] }
  0x5b   :  { %852 = vmatprep.mubr.bf16.mxu0 %v151_v20  ;;  %v192_v20 = vpack.c.bf16 %v129_v17, %v122_v16 }
  0x5c   :  { %812 = vmatmul.mubr.bf16.gmra.mrb[28].mxu1 %v197_v21  ;;  %v200_v21 = vpack.c.bf16 %v144_v19, %v137_v18 }
  0x5d   :  { %2238 = vmatprep.mubr.msk.bf16.mxu1 %vm601_vm0, %v152_v24  ;;  %v199_v24 = vpack.c.bf16 %v143_v23, %v136_v22 }
  0x62   :  { %853 = vmatmul.mubr.bf16.vlgmr.msra.gmra.mrb[32].mxu0 %v150_v27  ;;  %v2380_v27 = vld [vmem:[%s3274_s3 + $0x10] sm:$0xff]  }
  0x63   :  { %860 = vmatprep.mubr.bf16.mxu0 %v158_v30  ;;  %v3037_v30 = vld [vmem:[%s3273_s2] ss:$0 sm:$0xff]  ;;  %2279 = vmatpush3.bf16.msra.mxu0 %v2382_v43 }
  0x64   :  { %2239 = vmatmul.mubr.msk.bf16.vlgmr.msra.gmra.mrb[32].mxu1 %vm601_vm0, %v159_v33  ;;  %2280 = vmatprep.subr.bf16.mxu0 %v2383_v44 }
  0x65   :  { %2242 = vmatprep.mubr.msk.bf16.mxu1 %vm601_vm0, %v166_v34  ;;  %2255 = vmatpush3.bf16.msra.mxu1 %v2378_v25 }
  0x66   :  { %2256 = vmatprep.subr.bf16.mxu1 %v2379_v26 }
  0x67   :  { %2281 = vmatpush3.bf16.msra.mxu0 %v2383_v44 }
  0x69   :  { %2257 = vmatpush3.bf16.msra.mxu1 %v2379_v26 }
  0x6a   :  { %861 = vmatmul.mubr.bf16.gmra.mrb[36].mxu0 %v157_v39  ;;  %2258 = vmatprep.subr.bf16.mxu1 %v2380_v27 }
  0x6b   :  { %868 = vmatprep.mubr.bf16.mxu0 %v165_v42 }
  0x6c   :  { %2243 = vmatmul.mubr.msk.bf16.gmra.mrb[36].mxu1 %vm601_vm0, %v173_v45 }
  0x6d   :  { %2246 = vmatprep.mubr.msk.bf16.mxu1 %vm601_vm0, %v180_v46  ;;  %2259 = vmatpush3.bf16.msra.mxu1 %v2380_v27 }
  0x6e   :  { %2260 = vmatprep.subr.bf16.mxu1 %v2381_v28 }
  0x71   :  { %2261 = vmatpush3.bf16.msra.mxu1 %v2381_v28 }
  0x72   :  { %869 = vmatmul.mubr.bf16.gmra.mrb[40].mxu0 %v164_v51 }
  0x73   :  { %876 = vmatprep.mubr.bf16.mxu0 %v172_v54 }
  0x74   :  { %2247 = vmatmul.mubr.msk.bf16.gmra.mrb[40].mxu1 %vm601_vm0, %v187_v57 }
  0x75   :  { %2250 = vmatprep.mubr.msk.bf16.mxu1 %vm601_vm0, %v194_v58 }
  0x7a   :  { %877 = vmatmul.mubr.bf16.gmra.mrb[44].mxu0 %v171_v63 }
  0x7b   :  { %884 = vmatprep.mubr.bf16.mxu0 %v179_v2 }
  0x7c   :  { %2251 = vmatmul.mubr.msk.bf16.gmra.mrb[44].mxu1 %vm601_vm0, %v201_v3 }
  0x82   :  { %885 = vmatmul.mubr.bf16.gmra.mrb[48].mxu0 %v178_v8 }
  0x83   :  { %892 = vmatprep.mubr.bf16.mxu0 %v186_v9 }
  0x8a   :  { %893 = vmatmul.mubr.bf16.gmra.mrb[52].mxu0 %v185_v14 }
  0x8b   :  { %900 = vmatprep.mubr.bf16.mxu0 %v193_v15 }
  0x92   :  { %901 = vmatmul.mubr.bf16.gmra.mrb[56].mxu0 %v192_v20 }
  0x93   :  { %908 = vmatprep.mubr.bf16.mxu0 %v200_v21 }
  0x9a   :  { %909 = vmatmul.mubr.bf16.gmra.mrb[60].mxu0 %v199_v24 }
  0xf5   :  { %v2015_v29 = vpop.f32.mrb[0].mxu0 }
  0xf6   :  { %v2016_v31 = vpop.f32.mrb[1].mxu0 }
  0xf7   :  { %v2017_v32 = vadd.f32 %v2016_v31, %v2015_v29  ;;  %v2018_v33 = vpop.f32.mrb[2].mxu0  ;;  %v2079_v34 = vpop.f32.mrb[0].mxu1 }
  0xf8   :  { %v2019_v35 = vpop.f32.mrb[3].mxu0  ;;  %v2080_v38 = vpop.f32.mrb[1].mxu1 }
  0xf9   :  { %v661_v36 = vadd.f32 %v2017_v32, %v3037_v30  ;;  %v2020_v37 = vadd.f32 %v2019_v35, %v2018_v33  ;;  %v2081_v39 = vadd.f32 %v2080_v38, %v2079_v34  ;;  %v2082_v40 = vpop.f32.mrb[2].mxu1 }
  0xfa   :  { %v2083_v42 = vpop.f32.mrb[3].mxu1 }
  0xfb   :  { %v664_v41 = vadd.f32 %v2020_v37, %v3037_v30  ;;  %v3047_v45 = vadd.f32 %v2081_v39, %v661_v36  ;;  %v2084_v46 = vadd.f32 %v2083_v42, %v2082_v40 }
  0xfd   :  { %v2021_v47 = vpop.f32.mrb[4].mxu0  ;;  %v3049_v48 = vadd.f32 %v2084_v46, %v664_v41 }
  0xfe   :  { %v2022_v49 = vpop.f32.mrb[5].mxu0 }
  0xff   :  { %v2023_v50 = vadd.f32 %v2022_v49, %v2021_v47  ;;  %v2024_v51 = vpop.f32.mrb[6].mxu0  ;;  %v2085_v52 = vpop.f32.mrb[4].mxu1 }
 0x100   :  { %v2025_v53 = vpop.f32.mrb[7].mxu0  ;;  %v2086_v56 = vpop.f32.mrb[5].mxu1 }
 0x101   :  { %v669_v54 = vadd.f32 %v2023_v50, %v3037_v30  ;;  %v2026_v55 = vadd.f32 %v2025_v53, %v2024_v51  ;;  %v2087_v57 = vadd.f32 %v2086_v56, %v2085_v52  ;;  %v2088_v58 = vpop.f32.mrb[6].mxu1 }
 0x102   :  { %v2089_v60 = vpop.f32.mrb[7].mxu1 }
 0x103   :  { %v672_v59 = vadd.f32 %v2026_v55, %v3037_v30  ;;  %v3053_v61 = vadd.f32 %v2087_v57, %v669_v54  ;;  %v2090_v62 = vadd.f32 %v2089_v60, %v2088_v58 }
 0x105   :  { %v2027_v63 = vpop.f32.mrb[8].mxu0  ;;  %v3055_v0 = vadd.f32 %v2090_v62, %v672_v59 }
 0x106   :  { %v2028_v1 = vpop.f32.mrb[9].mxu0 }
 0x107   :  { %v2029_v2 = vadd.f32 %v2028_v1, %v2027_v63  ;;  %v2030_v3 = vpop.f32.mrb[10].mxu0  ;;  %v2091_v4 = vpop.f32.mrb[8].mxu1 }
 0x108   :  { %v2031_v5 = vpop.f32.mrb[11].mxu0  ;;  %v2092_v8 = vpop.f32.mrb[9].mxu1 }
 0x109   :  { %v677_v6 = vadd.f32 %v2029_v2, %v3037_v30  ;;  %v2032_v7 = vadd.f32 %v2031_v5, %v2030_v3  ;;  %v2093_v9 = vadd.f32 %v2092_v8, %v2091_v4  ;;  %v2094_v10 = vpop.f32.mrb[10].mxu1 }
 0x10a   :  { %v2095_v12 = vpop.f32.mrb[11].mxu1 }
 0x10b   :  { %v680_v11 = vadd.f32 %v2032_v7, %v3037_v30  ;;  %v3059_v13 = vadd.f32 %v2093_v9, %v677_v6  ;;  %v2096_v14 = vadd.f32 %v2095_v12, %v2094_v10 }
 0x10d   :  { %v2033_v15 = vpop.f32.mrb[12].mxu0  ;;  %v3061_v16 = vadd.f32 %v2096_v14, %v680_v11 }
 0x10e   :  { %v2034_v17 = vpop.f32.mrb[13].mxu0 }
 0x10f   :  { %v2035_v18 = vadd.f32 %v2034_v17, %v2033_v15  ;;  %v2036_v19 = vpop.f32.mrb[14].mxu0  ;;  %v2097_v20 = vpop.f32.mrb[12].mxu1 }
 0x110   :  { %v2037_v21 = vpop.f32.mrb[15].mxu0  ;;  %v2098_v24 = vpop.f32.mrb[13].mxu1 }
 0x111   :  { %v685_v22 = vadd.f32 %v2035_v18, %v3037_v30  ;;  %v2038_v23 = vadd.f32 %v2037_v21, %v2036_v19  ;;  %v2099_v25 = vadd.f32 %v2098_v24, %v2097_v20  ;;  %v2100_v26 = vpop.f32.mrb[14].mxu1 }
 0x112   :  { %v2101_v28 = vpop.f32.mrb[15].mxu1 }
 0x113   :  { %v688_v27 = vadd.f32 %v2038_v23, %v3037_v30  ;;  %v3065_v29 = vadd.f32 %v2099_v25, %v685_v22  ;;  %v2102_v31 = vadd.f32 %v2101_v28, %v2100_v26 }
 0x115   :  { %v2039_v32 = vpop.f32.mrb[16].mxu0  ;;  %v3067_v33 = vadd.f32 %v2102_v31, %v688_v27 }
 0x116   :  { %v2040_v34 = vpop.f32.mrb[17].mxu0 }
 0x117   :  { %v2041_v35 = vadd.f32 %v2040_v34, %v2039_v32  ;;  %v2042_v36 = vpop.f32.mrb[18].mxu0  ;;  %v2103_v37 = vpop.f32.mrb[16].mxu1 }
 0x118   :  { %v2043_v38 = vpop.f32.mrb[19].mxu0  ;;  %v2104_v41 = vpop.f32.mrb[17].mxu1 }
 0x119   :  { %v693_v39 = vadd.f32 %v2041_v35, %v3037_v30  ;;  %v2044_v40 = vadd.f32 %v2043_v38, %v2042_v36  ;;  %v2105_v42 = vadd.f32 %v2104_v41, %v2103_v37  ;;  %v2106_v43 = vpop.f32.mrb[18].mxu1 }
 0x11a   :  { %v2107_v46 = vpop.f32.mrb[19].mxu1 }
 0x11b   :  { %v696_v44 = vadd.f32 %v2044_v40, %v3037_v30  ;;  %v3071_v47 = vadd.f32 %v2105_v42, %v693_v39  ;;  %v2108_v49 = vadd.f32 %v2107_v46, %v2106_v43 }
 0x11d   :  { %v2045_v50 = vpop.f32.mrb[20].mxu0  ;;  %v3073_v51 = vadd.f32 %v2108_v49, %v696_v44 }
 0x11e   :  { %v2046_v52 = vpop.f32.mrb[21].mxu0 }
 0x11f   :  { %v2047_v53 = vadd.f32 %v2046_v52, %v2045_v50  ;;  %v2048_v54 = vpop.f32.mrb[22].mxu0  ;;  %v2109_v55 = vpop.f32.mrb[20].mxu1 }
 0x120   :  { %v2049_v56 = vpop.f32.mrb[23].mxu0  ;;  %v2110_v59 = vpop.f32.mrb[21].mxu1 }
 0x121   :  { %v701_v57 = vadd.f32 %v2047_v53, %v3037_v30  ;;  %v2050_v58 = vadd.f32 %v2049_v56, %v2048_v54  ;;  %v2111_v60 = vadd.f32 %v2110_v59, %v2109_v55  ;;  %v2112_v62 = vpop.f32.mrb[22].mxu1 }
 0x122   :  { %v2113_v1 = vpop.f32.mrb[23].mxu1 }
 0x123   :  { %v704_v63 = vadd.f32 %v2050_v58, %v3037_v30  ;;  %v3077_v2 = vadd.f32 %v2111_v60, %v701_v57  ;;  %v2114_v3 = vadd.f32 %v2113_v1, %v2112_v62 }
 0x125   :  { %v2051_v4 = vpop.f32.mrb[24].mxu0  ;;  %v3079_v5 = vadd.f32 %v2114_v3, %v704_v63 }
 0x126   :  { %v2052_v6 = vpop.f32.mrb[25].mxu0 }
 0x127   :  { %v2053_v7 = vadd.f32 %v2052_v6, %v2051_v4  ;;  %v2054_v8 = vpop.f32.mrb[26].mxu0  ;;  %v2115_v9 = vpop.f32.mrb[24].mxu1 }
 0x128   :  { %v2055_v10 = vpop.f32.mrb[27].mxu0  ;;  %v2116_v14 = vpop.f32.mrb[25].mxu1 }
 0x129   :  { %v709_v11 = vadd.f32 %v2053_v7, %v3037_v30  ;;  %v2056_v12 = vadd.f32 %v2055_v10, %v2054_v8  ;;  %v2117_v15 = vadd.f32 %v2116_v14, %v2115_v9  ;;  %v2118_v17 = vpop.f32.mrb[26].mxu1 }
 0x12a   :  { %v2119_v19 = vpop.f32.mrb[27].mxu1 }
 0x12b   :  { %v712_v18 = vadd.f32 %v2056_v12, %v3037_v30  ;;  %v3083_v20 = vadd.f32 %v2117_v15, %v709_v11  ;;  %v2120_v21 = vadd.f32 %v2119_v19, %v2118_v17 }
 0x12d   :  { %v2057_v22 = vpop.f32.mrb[28].mxu0  ;;  %v3085_v23 = vadd.f32 %v2120_v21, %v712_v18 }
 0x12e   :  { %v2058_v24 = vpop.f32.mrb[29].mxu0 }
 0x12f   :  { %v2059_v25 = vadd.f32 %v2058_v24, %v2057_v22  ;;  %v2060_v26 = vpop.f32.mrb[30].mxu0  ;;  %v2121_v27 = vpop.f32.mrb[28].mxu1 }
 0x130   :  { %v2061_v28 = vpop.f32.mrb[31].mxu0  ;;  %v2122_v34 = vpop.f32.mrb[29].mxu1 }
 0x131   :  { %v717_v31 = vadd.f32 %v2059_v25, %v3037_v30  ;;  %v2062_v32 = vadd.f32 %v2061_v28, %v2060_v26  ;;  %v2123_v35 = vadd.f32 %v2122_v34, %v2121_v27  ;;  %v2124_v36 = vpop.f32.mrb[30].mxu1 }
 0x132   :  { %v2125_v38 = vpop.f32.mrb[31].mxu1 }
 0x133   :  { %v720_v37 = vadd.f32 %v2062_v32, %v3037_v30  ;;  %v3089_v39 = vadd.f32 %v2123_v35, %v717_v31  ;;  %v2126_v40 = vadd.f32 %v2125_v38, %v2124_v36 }
 0x135   :  { %v2143_v41 = vpop.f32.mrb[32].mxu0  ;;  %v3091_v42 = vadd.f32 %v2126_v40, %v720_v37 }
 0x136   :  { %v2144_v43 = vpop.f32.mrb[33].mxu0 }
 0x137   :  { %v2145_v44 = vadd.f32 %v2144_v43, %v2143_v41  ;;  %v2146_v46 = vpop.f32.mrb[34].mxu0  ;;  %v2240_v50 = vpop.f32.mrb[32].mxu1 }
 0x138   :  { %v2147_v49 = vpop.f32.mrb[35].mxu0  ;;  %v951_v54 = vpop.f32.mrb[33].mxu1 }
 0x139   :  { %v2148_v52 = vadd.f32 %v2147_v49, %v2146_v46  ;;  %v855_v53 = vadd.f32 %v2145_v44, %v3047_v45  ;;  %v2241_v55 = vpop.f32.mrb[34].mxu1 }
 0x13a   :  { %v954_v57 = vpop.f32.mrb[35].mxu1 }
 0x13b   :  { %v952_v56 = vadd.f32 %v951_v54, %v855_v53  ;;  %v858_v30 = vadd.f32 %v2148_v52, %v3049_v48 }
 0x13d   :  { %v955_v58 = vadd.f32 %v954_v57, %v858_v30  ;;  %v2149_v59 = vpop.f32.mrb[36].mxu0  ;;  %v1014_v62 = vmax.f32 %v952_v56, 0.0 }
 0x13e   :  { %v2150_v60 = vpop.f32.mrb[37].mxu0 }
 0x13f   :  { %v1015_v63 = vmax.f32 %v955_v58, 0.0  ;;  %v2151_v1 = vadd.f32 %v2150_v60, %v2149_v59  ;;  %v2152_v3 = vpop.f32.mrb[38].mxu0  ;;  %v2244_v6 = vpop.f32.mrb[36].mxu1 }
 0x140   :  { %v2153_v4 = vpop.f32.mrb[39].mxu0  ;;  %v967_v9 = vpop.f32.mrb[37].mxu1 }
 0x141   :  { %v1030_v7 = vpack.c.bf16 %v1015_v63, %v1014_v62  ;;  %v863_v8 = vadd.f32 %v2151_v1, %v3053_v61  ;;  %v2154_v45 = vadd.f32 %v2153_v4, %v2152_v3  ;;  %v2245_v10 = vpop.f32.mrb[38].mxu1 }
 0x142   :  { %v970_v12 = vpop.f32.mrb[39].mxu1 }
 0x143   :  { %v960_v11 = vadd.f32 %v2240_v50, %v863_v8  ;;  %v866_v48 = vadd.f32 %v2154_v45, %v3055_v0  ;;  %2262 = vmatprep.mubr.msk.bf16.mxu1 %vm1077_vm1, %v1030_v7 }
 0x145   :  { %v963_v14 = vadd.f32 %v2241_v55, %v866_v48  ;;  %v2155_v15 = vpop.f32.mrb[40].mxu0  ;;  %v1016_v18 = vmax.f32 %v960_v11, 0.0 }
 0x146   :  { %v2156_v17 = vpop.f32.mrb[41].mxu0 }
 0x147   :  { %v1017_v19 = vmax.f32 %v963_v14, 0.0  ;;  %v2157_v21 = vadd.f32 %v2156_v17, %v2155_v15  ;;  %v2158_v22 = vpop.f32.mrb[42].mxu0  ;;  %v2248_v25 = vpop.f32.mrb[40].mxu1 }
 0x148   :  { %v2159_v24 = vpop.f32.mrb[43].mxu0  ;;  %v983_v28 = vpop.f32.mrb[41].mxu1 }
 0x149   :  { %v1031_v26 = vpack.c.bf16 %v1017_v19, %v1016_v18  ;;  %v2160_v61 = vadd.f32 %v2159_v24, %v2158_v22  ;;  %v871_v27 = vadd.f32 %v2157_v21, %v3059_v13  ;;  %v2249_v31 = vpop.f32.mrb[42].mxu1 }
 0x14a   :  { %v986_v34 = vpop.f32.mrb[43].mxu1 }
 0x14b   :  { %v968_v32 = vadd.f32 %v967_v9, %v871_v27  ;;  %2263 = vmatmul.mubr.msk.bf16.vlgmr.msra.gmra.mrb[48].mxu1 %vm1077_vm1, %v1031_v26  ;;  %v874_v0 = vadd.f32 %v2160_v61, %v3061_v16 }
 0x14d   :  { %v971_v35 = vadd.f32 %v970_v12, %v874_v0  ;;  %v2161_v36 = vpop.f32.mrb[44].mxu0  ;;  %v1018_v38 = vmax.f32 %v968_v32, 0.0 }
 0x14e   :  { %v2162_v37 = vpop.f32.mrb[45].mxu0 }
 0x14f   :  { %v1019_v40 = vmax.f32 %v971_v35, 0.0  ;;  %v2163_v41 = vadd.f32 %v2162_v37, %v2161_v36  ;;  %v2164_v43 = vpop.f32.mrb[46].mxu0  ;;  %v3101_v46 = vpop.f32.mrb[44].mxu1 }
 0x150   :  { %v2165_v44 = vpop.f32.mrb[47].mxu0  ;;  %v999_v52 = vpop.f32.mrb[45].mxu1 }
 0x151   :  { %v1032_v49 = vpack.c.bf16 %v1019_v40, %v1018_v38  ;;  %v879_v13 = vadd.f32 %v2163_v41, %v3065_v29  ;;  %v2166_v50 = vadd.f32 %v2165_v44, %v2164_v43  ;;  %v2253_v53 = vpop.f32.mrb[46].mxu1 }
 0x152   :  { %v1002_v55 = vpop.f32.mrb[47].mxu1 }
 0x153   :  { %v976_v54 = vadd.f32 %v2244_v6, %v879_v13  ;;  %v882_v16 = vadd.f32 %v2166_v50, %v3067_v33  ;;  %2266 = vmatprep.mubr.msk.bf16.mxu1 %vm1077_vm1, %v1032_v49 }
 0x155   :  { %v979_v56 = vadd.f32 %v2245_v10, %v882_v16  ;;  %v2167_v30 = vpop.f32.mrb[48].mxu0  ;;  %v1020_v58 = vmax.f32 %v976_v54, 0.0 }
 0x156   :  { %v2168_v57 = vpop.f32.mrb[49].mxu0 }
 0x157   :  { %v1021_v59 = vmax.f32 %v979_v56, 0.0  ;;  %v2169_v60 = vadd.f32 %v2168_v57, %v2167_v30  ;;  %v2170_v62 = vpop.f32.mrb[50].mxu0 }
 0x158   :  { %v2171_v63 = vpop.f32.mrb[51].mxu0 }
 0x159   :  { %v1033_v1 = vpack.c.bf16 %v1021_v59, %v1020_v58  ;;  %v2172_v3 = vadd.f32 %v2171_v63, %v2170_v62  ;;  %v887_v29 = vadd.f32 %v2169_v60, %v3071_v47 }
 0x15b   :  { %v984_v4 = vadd.f32 %v983_v28, %v887_v29  ;;  %2267 = vmatmul.mubr.msk.bf16.gmra.mrb[52].mxu1 %vm1077_vm1, %v1033_v1  ;;  %v890_v33 = vadd.f32 %v2172_v3, %v3073_v51 }
 0x15d   :  { %v987_v6 = vadd.f32 %v986_v34, %v890_v33  ;;  %v2173_v7 = vpop.f32.mrb[52].mxu0  ;;  %v1022_v45 = vmax.f32 %v984_v4, 0.0 }
 0x15e   :  { %v2174_v8 = vpop.f32.mrb[53].mxu0 }
 0x15f   :  { %v1023_v9 = vmax.f32 %v987_v6, 0.0  ;;  %v2175_v10 = vadd.f32 %v2174_v8, %v2173_v7  ;;  %v2176_v11 = vpop.f32.mrb[54].mxu0 }
 0x160   :  { %v2177_v48 = vpop.f32.mrb[55].mxu0 }
 0x161   :  { %v1034_v12 = vpack.c.bf16 %v1023_v9, %v1022_v45  ;;  %v895_v14 = vadd.f32 %v2175_v10, %v3077_v2  ;;  %v2178_v15 = vadd.f32 %v2177_v48, %v2176_v11 }
 0x163   :  { %v992_v17 = vadd.f32 %v2248_v25, %v895_v14  ;;  %v898_v47 = vadd.f32 %v2178_v15, %v3079_v5  ;;  %2270 = vmatprep.mubr.msk.bf16.mxu1 %vm1077_vm1, %v1034_v12 }
 0x165   :  { %v995_v18 = vadd.f32 %v2249_v31, %v898_v47  ;;  %v2179_v19 = vpop.f32.mrb[56].mxu0  ;;  %v1024_v21 = vmax.f32 %v992_v17, 0.0 }
 0x166   :  { %v2180_v51 = vpop.f32.mrb[57].mxu0 }
 0x167   :  { %v1025_v22 = vmax.f32 %v995_v18, 0.0  ;;  %v2181_v24 = vadd.f32 %v2180_v51, %v2179_v19  ;;  %v2182_v26 = vpop.f32.mrb[58].mxu0 }
 0x168   :  { %v2183_v61 = vpop.f32.mrb[59].mxu0 }
 0x169   :  { %v1035_v27 = vpack.c.bf16 %v1025_v22, %v1024_v21  ;;  %v2184_v28 = vadd.f32 %v2183_v61, %v2182_v26  ;;  %v903_v32 = vadd.f32 %v2181_v24, %v3083_v20 }
 0x16b   :  { %v1000_v0 = vadd.f32 %v999_v52, %v903_v32  ;;  %2271 = vmatmul.mubr.msk.bf16.gmra.mrb[56].mxu1 %vm1077_vm1, %v1035_v27  ;;  %v906_v2 = vadd.f32 %v2184_v28, %v3085_v23  ;;  %v2384_v52 = vld [vmem:[%s3276_s5 + $0x10] sm:$0xff]  }
 0x16c   :  { %2282 = vmatprep.subr.bf16.mxu0 %v2384_v52 }
 0x16d   :  { %v1003_v5 = vadd.f32 %v1002_v55, %v906_v2  ;;  %v2185_v25 = vpop.f32.mrb[60].mxu0  ;;  %v1026_v31 = vmax.f32 %v1000_v0, 0.0  ;;  %2283 = vmatpush3.bf16.msra.mxu0 %v2384_v52 }
 0x16e   :  { %v2186_v34 = vpop.f32.mrb[61].mxu0 }
 0x16f   :  { %v1027_v35 = vmax.f32 %v1003_v5, 0.0  ;;  %v2187_v36 = vadd.f32 %v2186_v34, %v2185_v25  ;;  %v2188_v37 = vpop.f32.mrb[62].mxu0 }
 0x170   :  { %v2189_v38 = vpop.f32.mrb[63].mxu0 }
 0x171   :  { %v1036_v40 = vpack.c.bf16 %v1027_v35, %v1026_v31  ;;  %v911_v41 = vadd.f32 %v2187_v36, %v3089_v39  ;;  %v2190_v43 = vadd.f32 %v2189_v38, %v2188_v37  ;;  %v2385_v39 = vld [vmem:[%s3276_s5 + $0x18] sm:$0xff]  }
 0x172   :  { %2284 = vmatprep.subr.bf16.mxu0 %v2385_v39 }
 0x173   :  { %v1008_v44 = vadd.f32 %v3101_v46, %v911_v41  ;;  %v914_v20 = vadd.f32 %v2190_v43, %v3091_v42  ;;  %2274 = vmatprep.mubr.msk.bf16.mxu1 %vm1077_vm1, %v1036_v40  ;;  %2285 = vmatpush3.bf16.msra.mxu0 %v2385_v39  ;;  %v2386_v42 = vld [vmem:[%s3278_s7] sm:$0xff]   ;;  %v2387_v46 = vld [vmem:[%s3278_s7 + $0x8] sm:$0xff]  }
 0x174   :  { %2302 = vmatprep.subr.bf16.mxu1 %v2386_v42 }
 0x175   :  { %v1011_v49 = vadd.f32 %v2253_v53, %v914_v20  ;;  %v1028_v23 = vmax.f32 %v1008_v44, 0.0  ;;  %2303 = vmatpush3.bf16.msra.mxu1 %v2386_v42  ;;  %v1881_v53 = vld [vmem:[%s3275_s4] ss:$0 sm:$0xff] }
 0x176   :  { %2304 = vmatprep.subr.bf16.mxu1 %v2387_v46 }
 0x177   :  { %v1029_v13 = vmax.f32 %v1011_v49, 0.0 }
 0x179   :  { %v1037_v50 = vpack.c.bf16 %v1029_v13, %v1028_v23  ;;  %2305 = vmatpush3.bf16.msra.mxu1 %v2387_v46  ;;  %v2388_v23 = vld [vmem:[%s3278_s7 + $0x10] sm:$0xff]   ;;  %v2389_v13 = vld [vmem:[%s3278_s7 + $0x18] sm:$0xff]  }
 0x17a   :  { %2306 = vmatprep.subr.bf16.mxu1 %v2388_v23 }
 0x17b   :  { %2275 = vmatmul.mubr.msk.bf16.gmra.mrb[60].mxu1 %vm1077_vm1, %v1037_v50  ;;  %v1894_v50 = vld [vmem:[%s3277_s6] ss:$0 sm:$0xff] }
 0x17d   :  { %2307 = vmatpush3.bf16.msra.mxu1 %v2388_v23 }
 0x17e   :  { %2308 = vmatprep.subr.bf16.mxu1 %v2389_v13 }
 0x181   :  { %2309 = vmatpush3.bf16.msra.mxu1 %v2389_v13 }
 0x21e   :  { %v2264_v54 = vpop.f32.mrb[48].mxu1 }
 0x21f   :  { %v1145_v16 = vadd.f32 %v2264_v54, %v1881_v53  ;;  %v1136_v55 = vpop.f32.mrb[49].mxu1 }
 0x220   :  { %v1137_v56 = vadd.f32 %v1881_v53, %v1136_v55  ;;  %v2265_v30 = vpop.f32.mrb[50].mxu1 }
 0x221   :  { %v1148_v57 = vadd.f32 %v2265_v30, %v1881_v53  ;;  %v1139_v58 = vpop.f32.mrb[51].mxu1  ;;  %v1201_v60 = vmax.f32 %v1145_v16, 0.0 }
 0x222   :  { %v1140_v59 = vadd.f32 %v1881_v53, %v1139_v58  ;;  %v1199_v63 = vmax.f32 %v1137_v56, 0.0 }
 0x223   :  { %v1202_v62 = vmax.f32 %v1148_v57, 0.0 }
 0x224   :  { %v1200_v1 = vmax.f32 %v1140_v59, 0.0 }
 0x225   :  { %v1216_v3 = vpack.c.bf16 %v1202_v62, %v1201_v60 }
 0x226   :  { %v1215_v29 = vpack.c.bf16 %v1200_v1, %v1199_v63 }
 0x228   :  { %2286 = vmatprep.mubr.msk.bf16.mxu0 %vm1077_vm1, %v1215_v29 }
 0x229   :  { %2287 = vmatmul.mubr.msk.bf16.vlgmr.msra.gmra.mrb[64].mxu0 %vm1077_vm1, %v1216_v3 }
 0x22e   :  { %v2268_v4 = vpop.f32.mrb[52].mxu1 }
 0x22f   :  { %v1161_v33 = vadd.f32 %v2268_v4, %v1881_v53  ;;  %v1152_v6 = vpop.f32.mrb[53].mxu1 }
 0x230   :  { %v1153_v7 = vadd.f32 %v1881_v53, %v1152_v6  ;;  %v2269_v8 = vpop.f32.mrb[54].mxu1 }
 0x231   :  { %v1164_v45 = vadd.f32 %v2269_v8, %v1881_v53  ;;  %v1155_v9 = vpop.f32.mrb[55].mxu1  ;;  %v1205_v11 = vmax.f32 %v1161_v33, 0.0 }
 0x232   :  { %v1156_v10 = vadd.f32 %v1881_v53, %v1155_v9  ;;  %v1203_v12 = vmax.f32 %v1153_v7, 0.0 }
 0x233   :  { %v1206_v48 = vmax.f32 %v1164_v45, 0.0 }
 0x234   :  { %v1204_v14 = vmax.f32 %v1156_v10, 0.0 }
 0x235   :  { %v1218_v15 = vpack.c.bf16 %v1206_v48, %v1205_v11 }
 0x236   :  { %v1217_v17 = vpack.c.bf16 %v1204_v14, %v1203_v12 }
 0x238   :  { %2290 = vmatprep.mubr.msk.bf16.mxu0 %vm1077_vm1, %v1217_v17 }
 0x239   :  { %2291 = vmatmul.mubr.msk.bf16.gmra.mrb[68].mxu0 %vm1077_vm1, %v1218_v15 }
 0x23e   :  { %v2272_v47 = vpop.f32.mrb[56].mxu1 }
 0x23f   :  { %v1177_v18 = vadd.f32 %v2272_v47, %v1881_v53  ;;  %v1168_v19 = vpop.f32.mrb[57].mxu1 }
 0x240   :  { %v1169_v51 = vadd.f32 %v1881_v53, %v1168_v19  ;;  %v2273_v21 = vpop.f32.mrb[58].mxu1 }
 0x241   :  { %v1180_v22 = vadd.f32 %v2273_v21, %v1881_v53  ;;  %v1171_v24 = vpop.f32.mrb[59].mxu1  ;;  %v1209_v61 = vmax.f32 %v1177_v18, 0.0 }
 0x242   :  { %v1172_v26 = vadd.f32 %v1881_v53, %v1171_v24  ;;  %v1207_v28 = vmax.f32 %v1169_v51, 0.0 }
 0x243   :  { %v1210_v27 = vmax.f32 %v1180_v22, 0.0 }
 0x244   :  { %v1208_v32 = vmax.f32 %v1172_v26, 0.0 }
 0x245   :  { %v1220_v0 = vpack.c.bf16 %v1210_v27, %v1209_v61 }
 0x246   :  { %v1219_v2 = vpack.c.bf16 %v1208_v32, %v1207_v28 }
 0x248   :  { %2294 = vmatprep.mubr.msk.bf16.mxu0 %vm1077_vm1, %v1219_v2 }
 0x249   :  { %2295 = vmatmul.mubr.msk.bf16.gmra.mrb[72].mxu0 %vm1077_vm1, %v1220_v0 }
 0x24e   :  { %v2276_v5 = vpop.f32.mrb[60].mxu1 }
 0x24f   :  { %v1193_v25 = vadd.f32 %v2276_v5, %v1881_v53  ;;  %v1184_v34 = vpop.f32.mrb[61].mxu1 }
 0x250   :  { %v1185_v31 = vadd.f32 %v1881_v53, %v1184_v34  ;;  %v2277_v35 = vpop.f32.mrb[62].mxu1 }
 0x251   :  { %v1196_v36 = vadd.f32 %v2277_v35, %v1881_v53  ;;  %v1187_v37 = vpop.f32.mrb[63].mxu1  ;;  %v1213_v40 = vmax.f32 %v1193_v25, 0.0 }
 0x252   :  { %v1188_v38 = vadd.f32 %v1881_v53, %v1187_v37  ;;  %v1211_v43 = vmax.f32 %v1185_v31, 0.0 }
 0x253   :  { %v1214_v41 = vmax.f32 %v1196_v36, 0.0 }
 0x254   :  { %v1212_v44 = vmax.f32 %v1188_v38, 0.0 }
 0x255   :  { %v1222_v20 = vpack.c.bf16 %v1214_v41, %v1213_v40  ;;  %v1907_v41 = vld [vmem:[%s3279_s8] ss:$0 sm:$0xff] }
 0x256   :  { %v1221_v49 = vpack.c.bf16 %v1212_v44, %v1211_v43 }
 0x258   :  { %2298 = vmatprep.mubr.msk.bf16.mxu0 %vm1077_vm1, %v1221_v49 }
 0x259   :  { %2299 = vmatmul.mubr.msk.bf16.gmra.mrb[76].mxu0 %vm1077_vm1, %v1222_v20 }
 0x2fc   :  { %v2288_v52 = vpop.f32.mrb[64].mxu0 }
 0x2fd   :  { %v1329_v39 = vadd.f32 %v2288_v52, %v1894_v50  ;;  %v1320_v42 = vpop.f32.mrb[65].mxu0 }
 0x2fe   :  { %v1321_v46 = vadd.f32 %v1894_v50, %v1320_v42  ;;  %v2289_v53 = vpop.f32.mrb[66].mxu0 }
 0x2ff   :  { %v1332_v54 = vadd.f32 %v2289_v53, %v1894_v50  ;;  %v1323_v16 = vpop.f32.mrb[67].mxu0  ;;  %v1385_v56 = vmax.f32 %v1329_v39, 0.0 }
 0x300   :  { %v1324_v55 = vadd.f32 %v1894_v50, %v1323_v16  ;;  %v1383_v57 = vmax.f32 %v1321_v46, 0.0 }
 0x301   :  { %v1386_v30 = vmax.f32 %v1332_v54, 0.0 }
 0x302   :  { %v1384_v58 = vmax.f32 %v1324_v55, 0.0 }
 0x303   :  { %v1400_v59 = vpack.c.bf16 %v1386_v30, %v1385_v56 }
 0x304   :  { %v1399_v60 = vpack.c.bf16 %v1384_v58, %v1383_v57 }
 0x306   :  { %2310 = vmatprep.mubr.msk.bf16.mxu1 %vm1077_vm1, %v1399_v60 }
 0x307   :  { %2311 = vmatmul.mubr.msk.bf16.vlgmr.msra.gmra.mrb[64].mxu1 %vm1077_vm1, %v1400_v59 }
 0x30c   :  { %v2292_v62 = vpop.f32.mrb[68].mxu0 }
 0x30d   :  { %v1345_v63 = vadd.f32 %v2292_v62, %v1894_v50  ;;  %v1336_v1 = vpop.f32.mrb[69].mxu0 }
 0x30e   :  { %v1337_v3 = vadd.f32 %v1894_v50, %v1336_v1  ;;  %v2293_v29 = vpop.f32.mrb[70].mxu0 }
 0x30f   :  { %v1348_v4 = vadd.f32 %v2293_v29, %v1894_v50  ;;  %v1339_v33 = vpop.f32.mrb[71].mxu0  ;;  %v1389_v7 = vmax.f32 %v1345_v63, 0.0 }
 0x310   :  { %v1340_v6 = vadd.f32 %v1894_v50, %v1339_v33  ;;  %v1387_v45 = vmax.f32 %v1337_v3, 0.0 }
 0x311   :  { %v1390_v8 = vmax.f32 %v1348_v4, 0.0 }
 0x312   :  { %v1388_v9 = vmax.f32 %v1340_v6, 0.0 }
 0x313   :  { %v1402_v10 = vpack.c.bf16 %v1390_v8, %v1389_v7 }
 0x314   :  { %v1401_v11 = vpack.c.bf16 %v1388_v9, %v1387_v45 }
 0x316   :  { %2314 = vmatprep.mubr.msk.bf16.mxu1 %vm1077_vm1, %v1401_v11 }
 0x317   :  { %2315 = vmatmul.mubr.msk.bf16.gmra.mrb[68].mxu1 %vm1077_vm1, %v1402_v10 }
 0x31c   :  { %v2296_v48 = vpop.f32.mrb[72].mxu0 }
 0x31d   :  { %v1361_v12 = vadd.f32 %v2296_v48, %v1894_v50  ;;  %v1352_v14 = vpop.f32.mrb[73].mxu0 }
 0x31e   :  { %v1353_v15 = vadd.f32 %v1894_v50, %v1352_v14  ;;  %v2297_v17 = vpop.f32.mrb[74].mxu0 }
 0x31f   :  { %v1364_v47 = vadd.f32 %v2297_v17, %v1894_v50  ;;  %v1355_v18 = vpop.f32.mrb[75].mxu0  ;;  %v1393_v51 = vmax.f32 %v1361_v12, 0.0 }
 0x320   :  { %v1356_v19 = vadd.f32 %v1894_v50, %v1355_v18  ;;  %v1391_v22 = vmax.f32 %v1353_v15, 0.0 }
 0x321   :  { %v1394_v21 = vmax.f32 %v1364_v47, 0.0 }
 0x322   :  { %v1392_v24 = vmax.f32 %v1356_v19, 0.0 }
 0x323   :  { %v1404_v26 = vpack.c.bf16 %v1394_v21, %v1393_v51 }
 0x324   :  { %v1403_v61 = vpack.c.bf16 %v1392_v24, %v1391_v22 }
 0x326   :  { %2318 = vmatprep.mubr.msk.bf16.mxu1 %vm1077_vm1, %v1403_v61 }
 0x327   :  { %2319 = vmatmul.mubr.msk.bf16.gmra.mrb[72].mxu1 %vm1077_vm1, %v1404_v26 }
 0x32c   :  { %v2300_v27 = vpop.f32.mrb[76].mxu0 }
 0x32d   :  { %v1377_v28 = vadd.f32 %v2300_v27, %v1894_v50  ;;  %v1368_v32 = vpop.f32.mrb[77].mxu0 }
 0x32e   :  { %v1369_v0 = vadd.f32 %v1894_v50, %v1368_v32  ;;  %v2301_v2 = vpop.f32.mrb[78].mxu0 }
 0x32f   :  { %v1380_v5 = vadd.f32 %v2301_v2, %v1894_v50  ;;  %v1371_v25 = vpop.f32.mrb[79].mxu0  ;;  %v1397_v31 = vmax.f32 %v1377_v28, 0.0 }
 0x330   :  { %v1372_v34 = vadd.f32 %v1894_v50, %v1371_v25  ;;  %v1395_v36 = vmax.f32 %v1369_v0, 0.0 }
 0x331   :  { %v1398_v35 = vmax.f32 %v1380_v5, 0.0 }
 0x332   :  { %v1396_v37 = vmax.f32 %v1372_v34, 0.0 }
 0x333   :  { %v1406_v38 = vpack.c.bf16 %v1398_v35, %v1397_v31 }
 0x334   :  { %v1405_v40 = vpack.c.bf16 %v1396_v37, %v1395_v36 }
 0x336   :  { %2322 = vmatprep.mubr.msk.bf16.mxu1 %vm1077_vm1, %v1405_v40 }
 0x337   :  { %2323 = vmatmul.mubr.msk.bf16.gmra.mrb[76].mxu1 %vm1077_vm1, %v1406_v38 }
 0x3da   :  { %v2312_v43 = vpop.f32.mrb[64].mxu1 }
 0x3db   :  { %v1513_v44 = vadd.f32 %v2312_v43, %v1907_v41  ;;  %v1504_v20 = vpop.f32.mrb[65].mxu1 }
 0x3dc   :  { %v1505_v49 = vadd.f32 %v1907_v41, %v1504_v20  ;;  %v2313_v23 = vpop.f32.mrb[66].mxu1 }
 0x3dd   :  { %1571 = vmax.xlane.f32.xlu1 %v1513_v44  ;;  %v1507_v13 = vpop.f32.mrb[67].mxu1  ;;  %v1516_v50 = vadd.f32 %v2313_v23, %v1907_v41 }
 0x3de   :  { %1567 = vmax.xlane.f32.xlu0 %v1505_v49  ;;  %v1508_v52 = vadd.f32 %v1907_v41, %v1507_v13 }
 0x3e1   :  { %1573 = vmax.xlane.f32.xlu1 %v1516_v50 }
 0x3e2   :  { %1569 = vmax.xlane.f32.xlu0 %v1508_v52 }
 0x3ea   :  { %v2316_v39 = vpop.f32.mrb[68].mxu1 }
 0x3eb   :  { %v1529_v42 = vadd.f32 %v2316_v39, %v1907_v41  ;;  %v1520_v46 = vpop.f32.mrb[69].mxu1 }
 0x3ec   :  { %v2317_v53 = vpop.f32.mrb[70].mxu1  ;;  %v1521_v55 = vadd.f32 %v1907_v41, %v1520_v46 }
 0x3ed   :  { %v1532_v54 = vadd.f32 %v2317_v53, %v1907_v41  ;;  %v1523_v16 = vpop.f32.mrb[71].mxu1  ;;  %1579 = vmax.xlane.f32.xlu0 %v1529_v42 }
 0x3ee   :  { %v1524_v56 = vadd.f32 %v1907_v41, %v1523_v16 }
 0x3ef   :  { %1581 = vmax.xlane.f32.xlu1 %v1532_v54 }
 0x3f1   :  { %1575 = vmax.xlane.f32.xlu0 %v1521_v55 }
 0x3f3   :  { %1577 = vmax.xlane.f32.xlu1 %v1524_v56 }
 0x3fa   :  { %v2320_v30 = vpop.f32.mrb[72].mxu1 }
 0x3fb   :  { %v3163_v57 = vadd.f32 %v2320_v30, %v1907_v41  ;;  %v1536_v58 = vpop.f32.mrb[73].mxu1 }
 0x3fc   :  { %v2321_v59 = vpop.f32.mrb[74].mxu1  ;;  %v3168_v63 = vadd.f32 %v1907_v41, %v1536_v58 }
 0x3fd   :  { %v3165_v60 = vadd.f32 %v2321_v59, %v1907_v41  ;;  %v1539_v62 = vpop.f32.mrb[75].mxu1  ;;  %1587 = vmax.xlane.f32.xlu0 %v3163_v57 }
 0x3fe   :  { %v3171_v1 = vadd.f32 %v1907_v41, %v1539_v62 }
 0x3ff   :  { %1589 = vmax.xlane.f32.xlu1 %v3165_v60 }
 0x401   :  { %1583 = vmax.xlane.f32.xlu0 %v3168_v63 }
 0x403   :  { %1585 = vmax.xlane.f32.xlu1 %v3171_v1 }
 0x40a   :  { %v2324_v3 = vpop.f32.mrb[76].mxu1 }
 0x40b   :  { %v1552_v29 = vpop.f32.mrb[77].mxu1  ;;  %v3180_v8 = vadd.f32 %v2324_v3, %v1907_v41 }
 0x40c   :  { %v3175_v4 = vadd.f32 %v1907_v41, %v1552_v29  ;;  %v2325_v33 = vpop.f32.mrb[78].mxu1 }
 0x40d   :  { %v1555_v6 = vpop.f32.mrb[79].mxu1  ;;  %v3183_v45 = vadd.f32 %v2325_v33, %v1907_v41 }
 0x40e   :  { %v3177_v7 = vadd.f32 %v1907_v41, %v1555_v6  ;;  %1591 = vmax.xlane.f32.xlu0 %v3175_v4 }
 0x410   :  { %1593 = vmax.xlane.f32.xlu1 %v3177_v7 }
 0x412   :  { %1595 = vmax.xlane.f32.xlu0 %v3180_v8 }
 0x414   :  { %1597 = vmax.xlane.f32.xlu1 %v3183_v45 }
 0x46a   :  { %v1572_v9 = vpop.xlane.xlu1 %1571 }
 0x46b   :  { %v3187_v10 = vsub.f32 %v1513_v44, %v1572_v9  ;;  %v1568_v11 = vpop.xlane.xlu0 %1567 }
 0x46c   :  { %v3189_v48 = vsub.f32 %v1505_v49, %v1568_v11 }
 0x46d   :  { %v1619_v12 = vmul.f32 1.442695, %v3187_v10 }
 0x46e   :  { %v1615_v14 = vmul.f32 1.442695, %v3189_v48  ;;  %v1574_v15 = vpop.xlane.xlu1 %1573 }
 0x46f   :  { %2390 = vpow2.f32 %v1619_v12  ;;  %v3193_v17 = vsub.f32 %v1516_v50, %v1574_v15  ;;  %v1570_v47 = vpop.xlane.xlu0 %1569 }
 0x470   :  { %v3195_v18 = vsub.f32 %v1508_v52, %v1570_v47  ;;  %2392 = vpow2.f32 %v1615_v14 }
 0x471   :  { %v1621_v19 = vmul.f32 1.442695, %v3193_v17 }
 0x472   :  { %v1617_v51 = vmul.f32 1.442695, %v3195_v18 }
 0x473   :  { %2394 = vpow2.f32 %v1621_v19 }
 0x474   :  { %2396 = vpow2.f32 %v1617_v51 }
 0x479   :  { %v2391_v21 = vpop.eup %2390 }
 0x47a   :  { %1651 = vadd.xlane.f32.xlu0 %v2391_v21  ;;  %v1580_v22 = vpop.xlane.xlu0 %1579  ;;  %v2393_v26 = vpop.eup %2392 }
 0x47b   :  { %v3199_v24 = vsub.f32 %v1529_v42, %v1580_v22 }
 0x47c   :  { %v1582_v61 = vpop.xlane.xlu1 %1581 }
 0x47d   :  { %v2395_v27 = vpop.eup %2394  ;;  %v1627_v28 = vmul.f32 1.442695, %v3199_v24  ;;  %v3202_v32 = vsub.f32 %v1532_v54, %v1582_v61 }
 0x47e   :  { %1653 = vadd.xlane.f32.xlu1 %v2395_v27  ;;  %1647 = vadd.xlane.f32.xlu0 %v2393_v26  ;;  %v1576_v0 = vpop.xlane.xlu0 %1575  ;;  %v2397_v34 = vpop.eup %2396 }
 0x47f   :  { %2398 = vpow2.f32 %v1627_v28  ;;  %v1629_v2 = vmul.f32 1.442695, %v3202_v32  ;;  %v3205_v5 = vsub.f32 %v1521_v55, %v1576_v0 }
 0x480   :  { %v1578_v25 = vpop.xlane.xlu1 %1577 }
 0x481   :  { %2400 = vpow2.f32 %v1629_v2  ;;  %v1623_v31 = vmul.f32 1.442695, %v3205_v5  ;;  %v3208_v35 = vsub.f32 %v1524_v56, %v1578_v25 }
 0x482   :  { %1649 = vadd.xlane.f32.xlu1 %v2397_v34 }
 0x483   :  { %2402 = vpow2.f32 %v1623_v31  ;;  %v1625_v36 = vmul.f32 1.442695, %v3208_v35 }
 0x485   :  { %2404 = vpow2.f32 %v1625_v36 }
 0x489   :  { %v2399_v37 = vpop.eup %2398 }
 0x48a   :  { %1659 = vadd.xlane.f32.xlu0 %v2399_v37  ;;  %v1588_v38 = vpop.xlane.xlu0 %1587 }
 0x48b   :  { %v2401_v40 = vpop.eup %2400  ;;  %v3212_v41 = vsub.f32 %v3163_v57, %v1588_v38 }
 0x48c   :  { %v1590_v43 = vpop.xlane.xlu1 %1589  ;;  %1661 = vadd.xlane.f32.xlu1 %v2401_v40 }
 0x48d   :  { %v2403_v44 = vpop.eup %2402  ;;  %v1635_v20 = vmul.f32 1.442695, %v3212_v41  ;;  %v3216_v49 = vsub.f32 %v3165_v60, %v1590_v43 }
 0x48e   :  { %1655 = vadd.xlane.f32.xlu0 %v2403_v44  ;;  %v1584_v23 = vpop.xlane.xlu0 %1583 }
 0x48f   :  { %v2405_v13 = vpop.eup %2404  ;;  %2406 = vpow2.f32 %v1635_v20  ;;  %v1637_v50 = vmul.f32 1.442695, %v3216_v49  ;;  %v3220_v52 = vsub.f32 %v3168_v63, %v1584_v23 }
 0x490   :  { %v1586_v39 = vpop.xlane.xlu1 %1585  ;;  %1657 = vadd.xlane.f32.xlu1 %v2405_v13 }
 0x491   :  { %2408 = vpow2.f32 %v1637_v50  ;;  %v1631_v42 = vmul.f32 1.442695, %v3220_v52  ;;  %v3224_v46 = vsub.f32 %v3171_v1, %v1586_v39 }
 0x493   :  { %2410 = vpow2.f32 %v1631_v42  ;;  %v1633_v53 = vmul.f32 1.442695, %v3224_v46 }
 0x495   :  { %2412 = vpow2.f32 %v1633_v53 }
 0x499   :  { %v2407_v54 = vpop.eup %2406 }
 0x49a   :  { %1667 = vadd.xlane.f32.xlu0 %v2407_v54 }
 0x49b   :  { %v2409_v16 = vpop.eup %2408  ;;  %v1592_v55 = vpop.xlane.xlu0 %1591 }
 0x49c   :  { %v3228_v56 = vsub.f32 %v3175_v4, %v1592_v55  ;;  %1669 = vadd.xlane.f32.xlu1 %v2409_v16 }
 0x49d   :  { %v2411_v30 = vpop.eup %2410  ;;  %v1594_v57 = vpop.xlane.xlu1 %1593 }
 0x49e   :  { %v1639_v58 = vmul.f32 1.442695, %v3228_v56  ;;  %v3232_v59 = vsub.f32 %v3177_v7, %v1594_v57  ;;  %1663 = vadd.xlane.f32.xlu0 %v2411_v30 }
 0x49f   :  { %v2413_v60 = vpop.eup %2412  ;;  %v1596_v62 = vpop.xlane.xlu0 %1595 }
 0x4a0   :  { %2414 = vpow2.f32 %v1639_v58  ;;  %v1641_v63 = vmul.f32 1.442695, %v3232_v59  ;;  %v3236_v1 = vsub.f32 %v3180_v8, %v1596_v62  ;;  %1665 = vadd.xlane.f32.xlu1 %v2413_v60 }
 0x4a1   :  { %v1598_v3 = vpop.xlane.xlu1 %1597 }
 0x4a2   :  { %2416 = vpow2.f32 %v1641_v63  ;;  %v1643_v29 = vmul.f32 1.442695, %v3236_v1  ;;  %v3240_v4 = vsub.f32 %v3183_v45, %v1598_v3 }
 0x4a4   :  { %2418 = vpow2.f32 %v1643_v29  ;;  %v1645_v33 = vmul.f32 1.442695, %v3240_v4 }
 0x4a6   :  { %2420 = vpow2.f32 %v1645_v33 }
 0x4aa   :  { %v2415_v6 = vpop.eup %2414 }
 0x4ab   :  { %1671 = vadd.xlane.f32.xlu0 %v2415_v6 }
 0x4ac   :  { %v2417_v7 = vpop.eup %2416 }
 0x4ad   :  { %1673 = vadd.xlane.f32.xlu1 %v2417_v7 }
 0x4ae   :  { %v2419_v9 = vpop.eup %2418 }
 0x4af   :  { %1675 = vadd.xlane.f32.xlu0 %v2419_v9 }
 0x4b0   :  { %v2421_v8 = vpop.eup %2420 }
 0x4b1   :  { %1677 = vadd.xlane.f32.xlu1 %v2421_v8 }
 0x507   :  { %v1652_v11 = vpop.xlane.xlu0 %1651 }
 0x508   :  { %2422 = vlog2.f32 %v1652_v11 }
 0x50b   :  { %v1654_v12 = vpop.xlane.xlu1 %1653  ;;  %v1648_v14 = vpop.xlane.xlu0 %1647 }
 0x50c   :  { %2424 = vlog2.f32 %v1654_v12 }
 0x50d   :  { %2426 = vlog2.f32 %v1648_v14 }
 0x50f   :  { %v1650_v45 = vpop.xlane.xlu1 %1649 }
 0x510   :  { %2428 = vlog2.f32 %v1650_v45 }
 0x512   :  { %v2423_v15 = vpop.eup %2422 }
 0x513   :  { %v1684_v47 = vmul.f32 0.6931472, %v2423_v15 }
 0x515   :  { %v1713_v26 = vsub.f32 %v3187_v10, %v1684_v47 }
 0x516   :  { %v2425_v19 = vpop.eup %2424 }
 0x517   :  { %v2427_v51 = vpop.eup %2426  ;;  %v1686_v21 = vmul.f32 0.6931472, %v2425_v19  ;;  %v1660_v22 = vpop.xlane.xlu0 %1659 }
 0x518   :  { %2430 = vlog2.f32 %v1660_v22  ;;  %v1680_v27 = vmul.f32 0.6931472, %v2427_v51 }
 0x519   :  { %v1714_v61 = vsub.f32 %v3193_v17, %v1686_v21  ;;  %v1662_v28 = vpop.xlane.xlu1 %1661 }
 0x51a   :  { %v2429_v0 = vpop.eup %2428  ;;  %2432 = vlog2.f32 %v1662_v28  ;;  %v1711_v31 = vsub.f32 %v3189_v48, %v1680_v27 }
 0x51b   :  { %v1960_v2 = vpack.c.bf16 %v1714_v61, %v1713_v26  ;;  %v1682_v25 = vmul.f32 0.6931472, %v2429_v0  ;;  %v1656_v34 = vpop.xlane.xlu0 %1655 }
 0x51c   :  { %2434 = vlog2.f32 %v1656_v34 }
 0x51d   :  { %1992 = vst [vmem:[#allocation2 + $0x8] sm:$0xff] %v1960_v2   ;;  %v1712_v36 = vsub.f32 %v3195_v18, %v1682_v25  ;;  %v1658_v37 = vpop.xlane.xlu1 %1657 }
 0x51e   :  { %2436 = vlog2.f32 %v1658_v37 }
 0x51f   :  { %v1955_v38 = vpack.c.bf16 %v1712_v36, %v1711_v31 }
 0x521   :  { %1956 = vst [vmem:[#allocation2] sm:$0xff] %v1955_v38  }
 0x522   :  { %v2431_v10 = vpop.eup %2430 }
 0x523   :  { %v1692_v40 = vmul.f32 0.6931472, %v2431_v10 }
 0x524   :  { %v2433_v17 = vpop.eup %2432 }
 0x525   :  { %v1694_v43 = vmul.f32 0.6931472, %v2433_v17  ;;  %v1717_v20 = vsub.f32 %v3199_v24, %v1692_v40 }
 0x526   :  { %v2435_v44 = vpop.eup %2434 }
 0x527   :  { %v1718_v23 = vsub.f32 %v3202_v32, %v1694_v43  ;;  %v1688_v13 = vmul.f32 0.6931472, %v2435_v44  ;;  %v1668_v50 = vpop.xlane.xlu0 %1667 }
 0x528   :  { %v2437_v39 = vpop.eup %2436  ;;  %2438 = vlog2.f32 %v1668_v50 }
 0x529   :  { %v1970_v48 = vpack.c.bf16 %v1718_v23, %v1717_v20  ;;  %v1690_v42 = vmul.f32 0.6931472, %v2437_v39  ;;  %v1670_v18 = vpop.xlane.xlu1 %1669  ;;  %v1715_v53 = vsub.f32 %v3205_v5, %v1688_v13 }
 0x52a   :  { %2440 = vlog2.f32 %v1670_v18 }
 0x52b   :  { %1994 = vst [vmem:[#allocation2 + $0x18] sm:$0xff] %v1970_v48   ;;  %v1716_v54 = vsub.f32 %v3208_v35, %v1690_v42  ;;  %v1664_v16 = vpop.xlane.xlu0 %1663 }
 0x52c   :  { %2442 = vlog2.f32 %v1664_v16 }
 0x52d   :  { %v1965_v55 = vpack.c.bf16 %v1716_v54, %v1715_v53  ;;  %v1666_v30 = vpop.xlane.xlu1 %1665 }
 0x52e   :  { %2444 = vlog2.f32 %v1666_v30 }
 0x52f   :  { %1993 = vst [vmem:[#allocation2 + $0x10] sm:$0xff] %v1965_v55  }
 0x532   :  { %v2439_v24 = vpop.eup %2438 }
 0x533   :  { %v1700_v32 = vmul.f32 0.6931472, %v2439_v24 }
 0x534   :  { %v2441_v57 = vpop.eup %2440 }
 0x535   :  { %v1702_v58 = vmul.f32 0.6931472, %v2441_v57  ;;  %v1721_v62 = vsub.f32 %v3212_v41, %v1700_v32 }
 0x536   :  { %v2443_v60 = vpop.eup %2442 }
 0x537   :  { %v1722_v63 = vsub.f32 %v3216_v49, %v1702_v58  ;;  %v1696_v3 = vmul.f32 0.6931472, %v2443_v60 }
 0x538   :  { %v2445_v29 = vpop.eup %2444  ;;  %v1672_v5 = vpop.xlane.xlu0 %1671 }
 0x539   :  { %v1980_v33 = vpack.c.bf16 %v1722_v63, %v1721_v62  ;;  %v1698_v35 = vmul.f32 0.6931472, %v2445_v29  ;;  %2446 = vlog2.f32 %v1672_v5  ;;  %v1719_v7 = vsub.f32 %v3220_v52, %v1696_v3 }
 0x53a   :  { %v1674_v6 = vpop.xlane.xlu1 %1673 }
 0x53b   :  { %1996 = vst [vmem:[#allocation2 + $0x28] sm:$0xff] %v1980_v33   ;;  %v1720_v9 = vsub.f32 %v3224_v46, %v1698_v35  ;;  %2448 = vlog2.f32 %v1674_v6 }
 0x53c   :  { %v1676_v8 = vpop.xlane.xlu0 %1675 }
 0x53d   :  { %v1975_v11 = vpack.c.bf16 %v1720_v9, %v1719_v7  ;;  %2450 = vlog2.f32 %v1676_v8 }
 0x53e   :  { %v1678_v12 = vpop.xlane.xlu1 %1677 }
 0x53f   :  { %1995 = vst [vmem:[#allocation2 + $0x20] sm:$0xff] %v1975_v11   ;;  %2452 = vlog2.f32 %v1678_v12 }
 0x543   :  { %v2447_v41 = vpop.eup %2446 }
 0x544   :  { %v1704_v49 = vmul.f32 0.6931472, %v2447_v41 }
 0x545   :  { %v2449_v14 = vpop.eup %2448 }
 0x546   :  { %v1706_v45 = vmul.f32 0.6931472, %v2449_v14  ;;  %v1723_v47 = vsub.f32 %v3228_v56, %v1704_v49 }
 0x547   :  { %v2451_v15 = vpop.eup %2450 }
 0x548   :  { %v1724_v19 = vsub.f32 %v3232_v59, %v1706_v45  ;;  %v1708_v51 = vmul.f32 0.6931472, %v2451_v15 }
 0x549   :  { %v2453_v52 = vpop.eup %2452 }
 0x54a   :  { %v1985_v21 = vpack.c.bf16 %v1724_v19, %v1723_v47  ;;  %v1710_v46 = vmul.f32 0.6931472, %v2453_v52  ;;  %v1725_v22 = vsub.f32 %v3236_v1, %v1708_v51 }
 0x54c   :  { %1997 = vst [vmem:[#allocation2 + $0x30] sm:$0xff] %v1985_v21   ;;  %v1726_v26 = vsub.f32 %v3240_v4, %v1710_v46 }
 0x54e   :  { %v1990_v61 = vpack.c.bf16 %v1726_v26, %v1725_v22 }
 0x550   :  { %1998 = vst [vmem:[#allocation2 + $0x38] sm:$0xff] %v1990_v61  }
 0x551   :  { %1811 = vsyncadd [#allocation3], 960  ;;  %s2478_s8 = smov [#allocation2]  }
 0x552   :  { %s1812_s13 = sshll.u32 %s2478_s8, 4  ;;  %s1813_s13 = int_to_ptr.vmem [resolvable:$true] %s1812_s13 }
 0x553   :  { %s2454_s14 = scalar_lea.vmem %s1813_s13, 64  ;;  %s2458_s15 = scalar_lea.vmem %s1813_s13, 1024 }
 0x554   :  { %p2455_p0 = scmp.ne.s32.totalorder %s1813_s13, %s2454_s14  ;;  %p2459_p1 = scmp.lt.s32.totalorder %s1813_s13, %s1813_s13 }
 0x555   :  { %p2460_p2 = scmp.lt.s32.totalorder %s2458_s15, %s2454_s14 }
 0x557   :  { %p2461_p3 = por %p2460_p2, %p2459_p1 }
 0x559   :  { %p2462_p4 = pnand %p2461_p3, %p2455_p0 }
 0x55b   :  { %2465 = shalt.err (!%p2462_p4)
}
 0x55c   :  { %s2466_s17 = scalar_lea.hbm %s3280_s9, 64 }
 0x55d   :  { %p2467_p5 = scmp.ne.s32.totalorder %s3280_s9, %s2466_s17  ;;  %p2470_p6 = scmp.lt.u32.totalorder %s2466_s17, %s3280_s9 }
 0x55f   :  { %p2472_p7 = pnand %p2470_p6, %p2467_p5 }
 0x561   :  { %2475 = shalt.err (!%p2472_p7)
}
 0x562   :  { %s2479_s19 = smov 64   ;;  %s2480_s20 = smov 4  }
 0x563   :  { %1818 = dma.vmem_to_hbm [thread:$0]  %s1813_s13, 64, %s3280_s9, [#allocation3], %s2479_s19, %s2479_s19, %s2480_s20  }
 0x564   :  { %2476 = dma.done.wait [#allocation3], 1024  }
 0x565   :  { %2477 = vsyncadd [#allocation3], 4294966272 }
 0x566   :  { %1822 = vsyncpa [#allocation3], 1 }

</bundles_post_ra>
